<compile_context>
chip_gen: v7x
topology: tpu7x:2x2x1
jax: 0.10.0
libtpu: 0.0.40
codegen_flags: <defaults>
</compile_context>

<pallas_src>
import functools

import jax
import jax.numpy as jnp
from jax.experimental import pallas as pl
from jax.experimental.pallas import tpu as pltpu

DIM = 2048          # option='resnet50' -> self.dim = 2048
UNIT = 100          # unit_size default
UNIT_PAD = 128      # lane-dense padded width
EPS = 1e-5          # nn.BatchNorm1d default eps


def _round_up(x, m):
    return ((x + m - 1) // m) * m


# ---------------------------------------------------------------------------
# Fused kernel: avg-pool (channel-reduction grid axis) + BN-folded MLP head.
#   grid = (batch_tiles, channel_tiles)   -- channel axis is the reduction.
#   featmap block : (TB, CT, HW) bf16
#   acc scratch   : (TB, 128)    f32   (resident across the channel axis)
# ---------------------------------------------------------------------------
def _fused_head_kernel(fm_ref, w1_ref, b1_ref, w2_ref, b2_ref, o_ref, acc_ref,
                       *, inv_hw):
    k = pl.program_id(1)

    @pl.when(k == 0)
    def _init():
        acc_ref[...] = jnp.zeros_like(acc_ref)

    # AdaptiveAvgPool2d((1,1)) on this channel slab: accumulate in f32.
    pooled = jnp.sum(fm_ref[...].astype(jnp.float32), axis=-1) * inv_hw  # (TB, CT)
    # Partial linear1 (bn1 already folded into w1/b1), f32 MXU accumulation.
    acc_ref[...] += jnp.dot(pooled.astype(jnp.bfloat16), w1_ref[...],
                            preferred_element_type=jnp.float32)

    @pl.when(k == pl.num_programs(1) - 1)
    def _finalize():
        # + b1' , relu ; dropout(eval) == identity
        h = jnp.maximum(acc_ref[...] + b1_ref[...], 0.0)
        # linear2 + folded bn2 (bf16 x bf16, f32 accumulation), relu
        h = jnp.dot(h.astype(jnp.bfloat16), w2_ref[...],
                    preferred_element_type=jnp.float32) + b2_ref[...]
        o_ref[...] = jnp.maximum(h, 0.0)


# ---------------------------------------------------------------------------
# Tiling heuristics
# ---------------------------------------------------------------------------
def _batch_tile(B, max_tb=512):
    """Multiple of 8, capped, and >= 2 tiles when B is large enough so the
    'parallel' batch axis actually shards across v7x's two TensorCores."""
    if B <= 8:
        return B
    return min(max_tb, _round_up((B + 1) // 2, 8))


def _channel_tile(TB, HW, budget_bytes=8 << 20):
    """Largest power-of-two divisor of DIM whose bf16 featmap block fits the
    per-buffer VMEM budget.  Accounts for lane padding of the HW dim."""
    hw_pad = _round_up(HW, 128)
    for ct in (512, 256, 128, 64, 32, 16, 8):   # cap 512 -> >= 4 reduction steps
        if TB * ct * hw_pad * 2 <= budget_bytes:
            return ct
    return 8


def _vmem_limit(TB, CT, HW):
    """Explicit VMEM budget (double-buffered inputs/outputs + scratch)."""
    hw_pad = _round_up(HW, 128)
    ct_pad = _round_up(CT, 16)
    fm_buf = TB * ct_pad * hw_pad * 2                 # bf16 featmap block
    w1_buf = ct_pad * UNIT_PAD * 2                    # bf16 w1 slab
    out_buf = TB * UNIT_PAD * 4                       # f32 output block
    total = (2 * fm_buf + 2 * w1_buf + 2 * out_buf
             + TB * UNIT_PAD * 4                      # f32 acc scratch
             + UNIT_PAD * UNIT_PAD * 2                # resident w2 (bf16)
             + 4 * 8 * UNIT_PAD * 4)                  # b1/b2 (padded) buffers
    return min(max(int(total * 1.5), 4 << 20), 48 << 20)


# ---------------------------------------------------------------------------
# Wrapper
# ---------------------------------------------------------------------------
def resbase_forward(featmap_nchw, folded):
    """featmap_nchw: (B, 2048, H, W) pre-avgpool ResNet feature map (NCHW).

    folded: BN-folded, lane-padded parameters from fold_and_pad_params().
    Returns (B, UNIT) f32 — ResBase.forward(x, reverse=False) in eval mode.
    """
    B, C, H, W = featmap_nchw.shape
    assert C == DIM
    HW = H * W

    # Free (contiguous) reshape: NCHW -> (B, C, H*W).  No transpose, no copy.
    fm = featmap_nchw.reshape(B, C, HW)
    if fm.dtype != jnp.bfloat16:        # keep HBM traffic at bf16
        fm = fm.astype(jnp.bfloat16)

    TB = _batch_tile(B)
    CT = _channel_tile(TB, HW)
    grid = (pl.cdiv(B, TB), DIM // CT)
    inv_hw = 1.0 / float(HW)

    out = pl.pallas_call(
        functools.partial(_fused_head_kernel, inv_hw=inv_hw),
        out_shape=jax.ShapeDtypeStruct((B, UNIT_PAD), jnp.float32),
        grid=grid,
        in_specs=[
            pl.BlockSpec((TB, CT, HW), lambda i, k: (i, k, 0)),     # featmap slab
            pl.BlockSpec((CT, UNIT_PAD), lambda i, k: (k, 0)),      # w1' slab
            pl.BlockSpec((1, UNIT_PAD), lambda i, k: (0, 0)),       # b1' resident
            pl.BlockSpec((UNIT_PAD, UNIT_PAD), lambda i, k: (0, 0)),  # w2' resident
            pl.BlockSpec((1, UNIT_PAD), lambda i, k: (0, 0)),       # b2' resident
        ],
        out_specs=pl.BlockSpec((TB, UNIT_PAD), lambda i, k: (i, 0)),
        scratch_shapes=[pltpu.VMEM((TB, UNIT_PAD), jnp.float32)],
        compiler_params=pltpu.CompilerParams(
            dimension_semantics=("parallel", "arbitrary"),
            vmem_limit_bytes=_vmem_limit(TB, CT, HW),
        ),
    )(fm, folded["w1"], folded["b1"], folded["w2"], folded["b2"])

    return out[:, :UNIT]                 # drop lane padding


# ---------------------------------------------------------------------------
# Parameter prep
# ---------------------------------------------------------------------------
def init_params(key):
    """Deterministic init matching ResBase.__init__ shapes.  Linear weights
    stored pre-transposed as (in, out).  BN params use PyTorch defaults."""
    k1, k2, k3, k4 = jax.random.split(key, 4)
    bound1 = 1.0 / jnp.sqrt(DIM)
    bound2 = 1.0 / jnp.sqrt(UNIT)
    return {
        "w1": jax.random.uniform(k1, (DIM, UNIT), jnp.float32, -bound1, bound1),
        "b1": jax.random.uniform(k2, (UNIT,), jnp.float32, -bound1, bound1),
        "g1": jnp.ones((UNIT,), jnp.float32),
        "be1": jnp.zeros((UNIT,), jnp.float32),
        "m1": jnp.zeros((UNIT,), jnp.float32),
        "v1": jnp.ones((UNIT,), jnp.float32),
        "w2": jax.random.uniform(k3, (UNIT, UNIT), jnp.float32, -bound2, bound2),
        "b2": jax.random.uniform(k4, (UNIT,), jnp.float32, -bound2, bound2),
        "g2": jnp.ones((UNIT,), jnp.float32),
        "be2": jnp.zeros((UNIT,), jnp.float32),
        "m2": jnp.zeros((UNIT,), jnp.float32),
        "v2": jnp.ones((UNIT,), jnp.float32),
    }


def fold_and_pad_params(p):
    """Fold eval-mode BatchNorm into the linears, zero-pad UNIT 100->128,
    and cast both weight matrices to bf16 (single-pass MXU)."""
    def fold(w, b, g, be, m, v):
        s = g * jax.lax.rsqrt(v + EPS)
        return w * s[None, :], (b - m) * s + be
    w1f, b1f = fold(p["w1"], p["b1"], p["g1"], p["be1"], p["m1"], p["v1"])
    w2f, b2f = fold(p["w2"], p["b2"], p["g2"], p["be2"], p["m2"], p["v2"])
    pad = UNIT_PAD - UNIT
    return {
        "w1": jnp.pad(w1f, ((0, 0), (0, pad))).astype(jnp.bfloat16),
        "b1": jnp.pad(b1f, ((0, pad),)).reshape(1, UNIT_PAD).astype(jnp.float32),
        "w2": jnp.pad(w2f, ((0, pad), (0, pad))).astype(jnp.bfloat16),
        "b2": jnp.pad(b2f, ((0, pad),)).reshape(1, UNIT_PAD).astype(jnp.float32),
    }


# ---------------------------------------------------------------------------
# Pure-JAX reference (un-folded, f32) of the same eval-mode forward.
# ---------------------------------------------------------------------------
def reference_forward(featmap_nchw, p):
    feats = jnp.mean(featmap_nchw, axis=(2, 3), dtype=jnp.float32)
    h = feats @ p["w1"] + p["b1"]
    h = (h - p["m1"]) / jnp.sqrt(p["v1"] + EPS) * p["g1"] + p["be1"]
    h = jnp.maximum(h, 0.0)
    h = h @ p["w2"] + p["b2"]
    h = (h - p["m2"]) / jnp.sqrt(p["v2"] + EPS) * p["g2"] + p["be2"]
    h = jnp.maximum(h, 0.0)
    return h


if __name__ == "__main__":
    key = jax.random.PRNGKey(0)
    k_x, k_p = jax.random.split(key)

    # Small pre-avgpool feature map (what self.features produces just before
    # its final AdaptiveAvgPool2d): B=2, C=2048, H=W=4, bf16.
    B, H, W = 2, 4, 4
    featmap = jax.random.normal(k_x, (B, DIM, H, W), dtype=jnp.bfloat16)

    params = init_params(k_p)
    folded = fold_and_pad_params(params)

    out = jax.block_until_ready(resbase_forward(featmap, folded))
    ref = reference_forward(featmap, params)

    assert out.shape == (B, UNIT)
    # Tolerance covers bf16 rounding of featmap / pooled feats / w1 / w2 / h
    # in the kernel vs the f32 reference (all accumulations are f32).
    assert jnp.allclose(out, ref, atol=5e-3, rtol=1e-2), "mismatch vs reference"

    print("KERNEL_OK")
</pallas_src>

<mosaic_0001>
module attributes {stable_mosaic.version = 11 : i64} {
  func.func @_fused_head_kernel(%arg0: i32, %arg1: i32, %arg2: memref<2x512x16xbf16, #tpu.memory_space<vmem>>, %arg3: memref<512x128xbf16, #tpu.memory_space<vmem>>, %arg4: memref<1x128xf32, #tpu.memory_space<vmem>>, %arg5: memref<128x128xbf16, #tpu.memory_space<vmem>>, %arg6: memref<1x128xf32, #tpu.memory_space<vmem>>, %arg7: memref<2x128xf32, #tpu.memory_space<vmem>>, %arg8: memref<2x128xf32, #tpu.memory_space<vmem>>) attributes {dimension_semantics = [#tpu.dimension_semantics<parallel>, #tpu.dimension_semantics<arbitrary>], iteration_bounds = array<i64: 1, 4>, scalar_prefetch = 0 : i64, scratch_operands = 1 : i64, tpu.core_type = #tpu.core_type<tc>, window_params = [{transform_indices = @transform_0, window_bounds = array<i64: 2, 512, 16>}, {transform_indices = @transform_1, window_bounds = array<i64: 512, 128>}, {pipeline_mode = #tpu.pipeline_mode<synchronous>, transform_indices = @transform_2, window_bounds = array<i64: 1, 128>}, {pipeline_mode = #tpu.pipeline_mode<synchronous>, transform_indices = @transform_3, window_bounds = array<i64: 128, 128>}, {pipeline_mode = #tpu.pipeline_mode<synchronous>, transform_indices = @transform_4, window_bounds = array<i64: 1, 128>}, {transform_indices = @transform_5, window_bounds = array<i64: 2, 128>}]} {
    %c0_i32 = arith.constant 0 : i32
    %0 = arith.cmpi eq, %arg1, %c0_i32 : i32
    %1 = arith.extui %0 : i1 to i32
    %c0_i32_0 = arith.constant 0 : i32
    %2 = arith.cmpi ne, %1, %c0_i32_0 : i32
    scf.if %2 {
      %cst_12 = arith.constant 0.000000e+00 : f32
      %17 = vector.broadcast %cst_12 : f32 to vector<2x128xf32>
      %c0_13 = arith.constant 0 : index
      %c0_14 = arith.constant 0 : index
      %18 = vector.load %arg8[%c0_13, %c0_14] : memref<2x128xf32, #tpu.memory_space<vmem>>, vector<2x128xf32>
      tpu.vector_store %arg8[%c0_13, %c0_14], %17 {strides = array<i32>} : memref<2x128xf32, #tpu.memory_space<vmem>>, vector<2x128xf32>,
    } else {
    }
    %c0 = arith.constant 0 : index
    %c0_1 = arith.constant 0 : index
    %c0_2 = arith.constant 0 : index
    %3 = vector.load %arg2[%c0, %c0_1, %c0_2] : memref<2x512x16xbf16, #tpu.memory_space<vmem>>, vector<2x512x16xbf16>
    %4 = arith.extf %3 : vector<2x512x16xbf16> to vector<2x512x16xf32>
    %cst = arith.constant dense<0.000000e+00> : vector<2x512xf32>
    %5 = vector.multi_reduction <add>, %4, %cst [2] : vector<2x512x16xf32> to vector<2x512xf32>
    %cst_3 = arith.constant 6.250000e-02 : f32
    %6 = vector.broadcast %cst_3 : f32 to vector<2x512xf32>
    %7 = arith.mulf %5, %6 : vector<2x512xf32>
    %c0_4 = arith.constant 0 : index
    %c0_5 = arith.constant 0 : index
    %8 = vector.load %arg8[%c0_4, %c0_5] : memref<2x128xf32, #tpu.memory_space<vmem>>, vector<2x128xf32>
    %9 = arith.truncf %7 : vector<2x512xf32> to vector<2x512xbf16>
    %c0_6 = arith.constant 0 : index
    %c0_7 = arith.constant 0 : index
    %10 = vector.load %arg3[%c0_6, %c0_7] : memref<512x128xbf16, #tpu.memory_space<vmem>>, vector<512x128xbf16>
    %cst_8 = arith.constant dense<0.000000e+00> : vector<2x128xf32>
    %11 = tpu.matmul %9, %10, %cst_8 {dimension_numbers = #tpu.dot_dimension_numbers<[1], [0], [0], [1], [0, 0, 1, 1], [], []>} : vector<2x512xbf16>, vector<512x128xbf16>, vector<2x128xf32> -> vector<2x128xf32>
    %12 = arith.addf %8, %11 : vector<2x128xf32>
    %c0_9 = arith.constant 0 : index
    %c0_10 = arith.constant 0 : index
    %13 = vector.load %arg8[%c0_9, %c0_10] : memref<2x128xf32, #tpu.memory_space<vmem>>, vector<2x128xf32>
    tpu.vector_store %arg8[%c0_9, %c0_10], %12 {strides = array<i32>} : memref<2x128xf32, #tpu.memory_space<vmem>>, vector<2x128xf32>,
    %c3_i32 = arith.constant 3 : i32
    %14 = arith.cmpi eq, %arg1, %c3_i32 : i32
    %15 = arith.extui %14 : i1 to i32
    %c0_i32_11 = arith.constant 0 : i32
    %16 = arith.cmpi ne, %15, %c0_i32_11 : i32
    scf.if %16 {
      %c0_12 = arith.constant 0 : index
      %c0_13 = arith.constant 0 : index
      %17 = vector.load %arg8[%c0_12, %c0_13] : memref<2x128xf32, #tpu.memory_space<vmem>>, vector<2x128xf32>
      %c0_14 = arith.constant 0 : index
      %c0_15 = arith.constant 0 : index
      %18 = vector.load %arg4[%c0_14, %c0_15] : memref<1x128xf32, #tpu.memory_space<vmem>>, vector<1x128xf32>
      %19 = vector.broadcast %18 : vector<1x128xf32> to vector<2x128xf32>
      %20 = arith.addf %17, %19 : vector<2x128xf32>
      %cst_16 = arith.constant 0.000000e+00 : f32
      %21 = vector.broadcast %cst_16 : f32 to vector<2x128xf32>
      %22 = arith.maximumf %20, %21 : vector<2x128xf32>
      %23 = arith.truncf %22 : vector<2x128xf32> to vector<2x128xbf16>
      %c0_17 = arith.constant 0 : index
      %c0_18 = arith.constant 0 : index
      %24 = vector.load %arg5[%c0_17, %c0_18] : memref<128x128xbf16, #tpu.memory_space<vmem>>, vector<128x128xbf16>
      %cst_19 = arith.constant dense<0.000000e+00> : vector<2x128xf32>
      %25 = tpu.matmul %23, %24, %cst_19 {dimension_numbers = #tpu.dot_dimension_numbers<[1], [0], [0], [1], [0, 0, 1, 1], [], []>} : vector<2x128xbf16>, vector<128x128xbf16>, vector<2x128xf32> -> vector<2x128xf32>
      %c0_20 = arith.constant 0 : index
      %c0_21 = arith.constant 0 : index
      %26 = vector.load %arg6[%c0_20, %c0_21] : memref<1x128xf32, #tpu.memory_space<vmem>>, vector<1x128xf32>
      %27 = vector.broadcast %26 : vector<1x128xf32> to vector<2x128xf32>
      %28 = arith.addf %25, %27 : vector<2x128xf32>
      %cst_22 = arith.constant 0.000000e+00 : f32
      %29 = vector.broadcast %cst_22 : f32 to vector<2x128xf32>
      %30 = arith.maximumf %28, %29 : vector<2x128xf32>
      %c0_23 = arith.constant 0 : index
      %c0_24 = arith.constant 0 : index
      %31 = vector.load %arg7[%c0_23, %c0_24] : memref<2x128xf32, #tpu.memory_space<vmem>>, vector<2x128xf32>
      tpu.vector_store %arg7[%c0_23, %c0_24], %30 {strides = array<i32>} : memref<2x128xf32, #tpu.memory_space<vmem>>, vector<2x128xf32>,
    } else {
    }
    return
  }
  func.func @transform_0(%arg0: i32, %arg1: i32) -> (i32, i32, i32) {
    %c0_i32 = arith.constant 0 : i32
    %c0_i32_0 = arith.constant 0 : i32
    return %arg0, %arg1, %c0_i32 : i32, i32, i32
  }
  func.func @transform_1(%arg0: i32, %arg1: i32) -> (i32, i32) {
    %c0_i32 = arith.constant 0 : i32
    %c0_i32_0 = arith.constant 0 : i32
    return %arg1, %c0_i32 : i32, i32
  }
  func.func @transform_2(%arg0: i32, %arg1: i32) -> (i32, i32) {
    %c0_i32 = arith.constant 0 : i32
    %c0_i32_0 = arith.constant 0 : i32
    %c0_i32_1 = arith.constant 0 : i32
    return %c0_i32, %c0_i32_0 : i32, i32
  }
  func.func @transform_3(%arg0: i32, %arg1: i32) -> (i32, i32) {
    %c0_i32 = arith.constant 0 : i32
    %c0_i32_0 = arith.constant 0 : i32
    %c0_i32_1 = arith.constant 0 : i32
    return %c0_i32, %c0_i32_0 : i32, i32
  }
  func.func @transform_4(%arg0: i32, %arg1: i32) -> (i32, i32) {
    %c0_i32 = arith.constant 0 : i32
    %c0_i32_0 = arith.constant 0 : i32
    %c0_i32_1 = arith.constant 0 : i32
    return %c0_i32, %c0_i32_0 : i32, i32
  }
  func.func @transform_5(%arg0: i32, %arg1: i32) -> (i32, i32) {
    %c0_i32 = arith.constant 0 : i32
    %c0_i32_0 = arith.constant 0 : i32
    return %arg0, %c0_i32 : i32, i32
  }
}

</mosaic_0001>

<bundles_post_ra>
// kernel: tpu_custom_call.1
= control target key start
LH: loop header
LB: loop body
LE: loop exit
PB: predicated region body
PF: predicated region fallthrough
CT: control target
= control target key end

     0   :  { %10 = vsyncpa [#allocation5], 0  ;;  %s3707_s18 = smov 0   ;;  %s3709_s19 = smov 0   ;;  %s4696_s0 = inlined_call_operand.vmem [shape: bf16[2,2048,16], index: 0, kind: input, shape index: {}]   ;;  %s4697_s1 = inlined_call_operand.vmem [shape: bf16[2048,128], index: 1, kind: input, shape index: {}]   ;;  %s4698_s2 = inlined_call_operand.vmem [shape: f32[1,128], index: 2, kind: input, shape index: {}]   ;;  %s4699_s3 = inlined_call_operand.vmem [shape: bf16[128,128], index: 3, kind: input, shape index: {}]   ;;  %s4700_s4 = inlined_call_operand.vmem [shape: f32[1,128], index: 4, kind: input, shape index: {}]   ;;  %s4701_s5 = inlined_call_operand.hbm [shape: f32[2,128], index: 5, kind: output, shape index: {}]  }
   0x1   :  { %s3711_s20 = smov 0   ;;  %s3713_s21 = smov 0  }
   0x2   :  { %s3715_s22 = smov 0  }
   0x3 LB: > { %s3062_s23 = sadd.s32 4294967295, %s3671_s22   ;;  %s25_s24 = sadd.s32 1, %s3667_s21  ;;  %s3671_s22 = sphi %s3715_s22, %s16_s22   ;;  %s3667_s21 = sphi %s3713_s21, %s4706_s21   ;;  %s3663_s20 = sphi %s3711_s20, %s4705_s20   ;;  %s3659_s19 = sphi %s3709_s19, %s4704_s19   ;;  %s3655_s18 = sphi %s3707_s18, %s4703_s18  }
   0x4   : > { %p26_p0 = scmp.ge.s32.totalorder %s25_s24, 4  ;;  %p44_p1 = scmp.ne.s32.totalorder %s3659_s19, %s3655_s18 }
   0x5   : > { %p45_p2 = scmp.eq.s32.totalorder %s3671_s22, 0  ;;  %s37_s26 = sadd.s32 1, %s3659_s19 }
   0x6   : > { %s4708_s24 = smov (%p26_p0, %s25_s24), 0  ;;  %p3064_p5 = scmp.ge.s32.totalorder %s3671_s22, 4 }
   0x7   : > { %p46_p3 = por %p45_p2, %p44_p1  ;;  %s33_s25 = ssub.s32 %s3667_s21, %s4708_s24 }
   0x8   : > { %p35_p4 = scmp.eq.s32.totalorder %s33_s25, 0  ;;  %194 = sbr.rel (%p3064_p5) target bundleno = 51 (0x33), region = 28 }
   0xa   : > { %s3743_s27 = scalar_select %p35_p4, %s3659_s19, %s37_s26  }
   0xf   : > { %197 = sbr.rel (!%p46_p3) target bundleno = 51 (0x33), region = 32  ;;  %s199_s28 = sand.u32 (%p46_p3), 1, %s3659_s19  }
  0x10   : > { %s3120_s29 = sshll.u32 (%p46_p3), %s3667_s21, 8  ;;  %s3065_s30 = sshll.u32 (%p46_p3), %s199_s28, 9 }
  0x11   : > { %s3751_s8 = scalar_lea.vmem (%p46_p3), %s4696_s0, %s3120_s29  ;;  %s3756_s9 = scalar_lea.vmem (%p46_p3), [#allocation3], %s3065_s30 }
  0x12   : > { %v223_v0 = vld [vmem:[%s3751_s8] sm:$0xff] (%p46_p3)   ;;  %v227_v1 = vld [vmem:[%s3751_s8 + $0x8] sm:$0xff] (%p46_p3)   ;;  %v231_v2 = vld [vmem:[%s3751_s8 + $0x10] sm:$0xff] (%p46_p3)  }
  0x13   : > { %224 = vst [vmem:[%s3756_s9] sm:$0xff] (%p46_p3), %v223_v0   ;;  %228 = vst [vmem:[%s3756_s9 + $0x8] sm:$0xff] (%p46_p3), %v227_v1   ;;  %v235_v3 = vld [vmem:[%s3751_s8 + $0x18] sm:$0xff] (%p46_p3)   ;;  %v239_v4 = vld [vmem:[%s3751_s8 + $0x20] sm:$0xff] (%p46_p3)  }
  0x14   : > { %232 = vst [vmem:[%s3756_s9 + $0x10] sm:$0xff] (%p46_p3), %v231_v2   ;;  %v243_v5 = vld [vmem:[%s3751_s8 + $0x28] sm:$0xff] (%p46_p3)   ;;  %236 = vst [vmem:[%s3756_s9 + $0x18] sm:$0xff] (%p46_p3), %v235_v3   ;;  %v247_v6 = vld [vmem:[%s3751_s8 + $0x30] sm:$0xff] (%p46_p3)  }
  0x15   : > { %240 = vst [vmem:[%s3756_s9 + $0x20] sm:$0xff] (%p46_p3), %v239_v4   ;;  %244 = vst [vmem:[%s3756_s9 + $0x28] sm:$0xff] (%p46_p3), %v243_v5   ;;  %v251_v7 = vld [vmem:[%s3751_s8 + $0x38] sm:$0xff] (%p46_p3)   ;;  %v255_v8 = vld [vmem:[%s3751_s8 + $0x40] sm:$0xff] (%p46_p3)  }
  0x16   : > { %248 = vst [vmem:[%s3756_s9 + $0x30] sm:$0xff] %v247_v6   ;;  %252 = vst [vmem:[%s3756_s9 + $0x38] sm:$0xff] %v251_v7   ;;  %v259_v9 = vld [vmem:[%s3751_s8 + $0x48] sm:$0xff]   ;;  %v263_v10 = vld [vmem:[%s3751_s8 + $0x50] sm:$0xff]  }
  0x17   : > { %256 = vst [vmem:[%s3756_s9 + $0x40] sm:$0xff] %v255_v8   ;;  %v267_v11 = vld [vmem:[%s3751_s8 + $0x58] sm:$0xff]   ;;  %260 = vst [vmem:[%s3756_s9 + $0x48] sm:$0xff] %v259_v9   ;;  %v271_v12 = vld [vmem:[%s3751_s8 + $0x60] sm:$0xff]  }
  0x18   : > { %264 = vst [vmem:[%s3756_s9 + $0x50] sm:$0xff] %v263_v10   ;;  %268 = vst [vmem:[%s3756_s9 + $0x58] sm:$0xff] %v267_v11   ;;  %v275_v13 = vld [vmem:[%s3751_s8 + $0x68] sm:$0xff]   ;;  %v279_v14 = vld [vmem:[%s3751_s8 + $0x70] sm:$0xff]  }
  0x19   : > { %272 = vst [vmem:[%s3756_s9 + $0x60] sm:$0xff] %v271_v12   ;;  %276 = vst [vmem:[%s3756_s9 + $0x68] sm:$0xff] %v275_v13   ;;  %v283_v15 = vld [vmem:[%s3751_s8 + $0x78] sm:$0xff]   ;;  %v287_v16 = vld [vmem:[%s3751_s8 + $0x80] sm:$0xff]  }
  0x1a   : > { %280 = vst [vmem:[%s3756_s9 + $0x70] sm:$0xff] %v279_v14   ;;  %v291_v17 = vld [vmem:[%s3751_s8 + $0x88] sm:$0xff]   ;;  %284 = vst [vmem:[%s3756_s9 + $0x78] sm:$0xff] %v283_v15   ;;  %v295_v18 = vld [vmem:[%s3751_s8 + $0x90] sm:$0xff]  }
  0x1b   : > { %288 = vst [vmem:[%s3756_s9 + $0x80] sm:$0xff] %v287_v16   ;;  %292 = vst [vmem:[%s3756_s9 + $0x88] sm:$0xff] %v291_v17   ;;  %v299_v19 = vld [vmem:[%s3751_s8 + $0x98] sm:$0xff]   ;;  %v303_v20 = vld [vmem:[%s3751_s8 + $0xa0] sm:$0xff]  }
  0x1c   : > { %296 = vst [vmem:[%s3756_s9 + $0x90] sm:$0xff] %v295_v18   ;;  %300 = vst [vmem:[%s3756_s9 + $0x98] sm:$0xff] %v299_v19   ;;  %v307_v21 = vld [vmem:[%s3751_s8 + $0xa8] sm:$0xff]   ;;  %v311_v22 = vld [vmem:[%s3751_s8 + $0xb0] sm:$0xff]  }
  0x1d   : > { %304 = vst [vmem:[%s3756_s9 + $0xa0] sm:$0xff] %v303_v20   ;;  %v315_v23 = vld [vmem:[%s3751_s8 + $0xb8] sm:$0xff]   ;;  %308 = vst [vmem:[%s3756_s9 + $0xa8] sm:$0xff] %v307_v21   ;;  %v319_v24 = vld [vmem:[%s3751_s8 + $0xc0] sm:$0xff]  }
  0x1e   : > { %312 = vst [vmem:[%s3756_s9 + $0xb0] sm:$0xff] %v311_v22   ;;  %316 = vst [vmem:[%s3756_s9 + $0xb8] sm:$0xff] %v315_v23   ;;  %v323_v25 = vld [vmem:[%s3751_s8 + $0xc8] sm:$0xff]   ;;  %v327_v26 = vld [vmem:[%s3751_s8 + $0xd0] sm:$0xff]  }
  0x1f   : > { %320 = vst [vmem:[%s3756_s9 + $0xc0] sm:$0xff] %v319_v24   ;;  %324 = vst [vmem:[%s3756_s9 + $0xc8] sm:$0xff] %v323_v25   ;;  %v331_v27 = vld [vmem:[%s3751_s8 + $0xd8] sm:$0xff]   ;;  %v335_v28 = vld [vmem:[%s3751_s8 + $0xe0] sm:$0xff]  }
  0x20   : > { %328 = vst [vmem:[%s3756_s9 + $0xd0] sm:$0xff] %v327_v26   ;;  %v339_v29 = vld [vmem:[%s3751_s8 + $0xe8] sm:$0xff]   ;;  %332 = vst [vmem:[%s3756_s9 + $0xd8] sm:$0xff] %v331_v27   ;;  %v343_v30 = vld [vmem:[%s3751_s8 + $0xf0] sm:$0xff]  }
  0x21   : > { %336 = vst [vmem:[%s3756_s9 + $0xe0] sm:$0xff] %v335_v28   ;;  %340 = vst [vmem:[%s3756_s9 + $0xe8] sm:$0xff] %v339_v29   ;;  %v347_v31 = vld [vmem:[%s3751_s8 + $0xf8] sm:$0xff]   ;;  %v351_v32 = vld [vmem:[%s3751_s8 + $0x400] sm:$0xff]  }
  0x22   : > { %344 = vst [vmem:[%s3756_s9 + $0xf0] sm:$0xff] %v343_v30   ;;  %348 = vst [vmem:[%s3756_s9 + $0xf8] sm:$0xff] %v347_v31   ;;  %v355_v33 = vld [vmem:[%s3751_s8 + $0x408] sm:$0xff]   ;;  %v359_v34 = vld [vmem:[%s3751_s8 + $0x410] sm:$0xff]  }
  0x23   : > { %352 = vst [vmem:[%s3756_s9 + $0x100] sm:$0xff] %v351_v32   ;;  %v363_v35 = vld [vmem:[%s3751_s8 + $0x418] sm:$0xff]   ;;  %356 = vst [vmem:[%s3756_s9 + $0x108] sm:$0xff] %v355_v33   ;;  %v367_v36 = vld [vmem:[%s3751_s8 + $0x420] sm:$0xff]  }
  0x24   : > { %360 = vst [vmem:[%s3756_s9 + $0x110] sm:$0xff] %v359_v34   ;;  %364 = vst [vmem:[%s3756_s9 + $0x118] sm:$0xff] %v363_v35   ;;  %v371_v37 = vld [vmem:[%s3751_s8 + $0x428] sm:$0xff]   ;;  %v375_v38 = vld [vmem:[%s3751_s8 + $0x430] sm:$0xff]  }
  0x25   : > { %368 = vst [vmem:[%s3756_s9 + $0x120] sm:$0xff] %v367_v36   ;;  %372 = vst [vmem:[%s3756_s9 + $0x128] sm:$0xff] %v371_v37   ;;  %v379_v39 = vld [vmem:[%s3751_s8 + $0x438] sm:$0xff]   ;;  %v383_v40 = vld [vmem:[%s3751_s8 + $0x440] sm:$0xff]  }
  0x26   : > { %376 = vst [vmem:[%s3756_s9 + $0x130] sm:$0xff] %v375_v38   ;;  %v387_v41 = vld [vmem:[%s3751_s8 + $0x448] sm:$0xff]   ;;  %380 = vst [vmem:[%s3756_s9 + $0x138] sm:$0xff] %v379_v39   ;;  %v391_v42 = vld [vmem:[%s3751_s8 + $0x450] sm:$0xff]  }
  0x27   : > { %384 = vst [vmem:[%s3756_s9 + $0x140] sm:$0xff] %v383_v40   ;;  %388 = vst [vmem:[%s3756_s9 + $0x148] sm:$0xff] %v387_v41   ;;  %v395_v43 = vld [vmem:[%s3751_s8 + $0x458] sm:$0xff]   ;;  %v399_v44 = vld [vmem:[%s3751_s8 + $0x460] sm:$0xff]  }
  0x28   : > { %392 = vst [vmem:[%s3756_s9 + $0x150] sm:$0xff] %v391_v42   ;;  %396 = vst [vmem:[%s3756_s9 + $0x158] sm:$0xff] %v395_v43   ;;  %v403_v45 = vld [vmem:[%s3751_s8 + $0x468] sm:$0xff]   ;;  %v407_v46 = vld [vmem:[%s3751_s8 + $0x470] sm:$0xff]  }
  0x29   : > { %400 = vst [vmem:[%s3756_s9 + $0x160] sm:$0xff] %v399_v44   ;;  %v411_v47 = vld [vmem:[%s3751_s8 + $0x478] sm:$0xff]   ;;  %404 = vst [vmem:[%s3756_s9 + $0x168] sm:$0xff] %v403_v45   ;;  %v415_v48 = vld [vmem:[%s3751_s8 + $0x480] sm:$0xff]  }
  0x2a   : > { %408 = vst [vmem:[%s3756_s9 + $0x170] sm:$0xff] %v407_v46   ;;  %412 = vst [vmem:[%s3756_s9 + $0x178] sm:$0xff] %v411_v47   ;;  %v419_v49 = vld [vmem:[%s3751_s8 + $0x488] sm:$0xff]   ;;  %v423_v50 = vld [vmem:[%s3751_s8 + $0x490] sm:$0xff]  }
  0x2b   : > { %416 = vst [vmem:[%s3756_s9 + $0x180] sm:$0xff] %v415_v48   ;;  %420 = vst [vmem:[%s3756_s9 + $0x188] sm:$0xff] %v419_v49   ;;  %v427_v51 = vld [vmem:[%s3751_s8 + $0x498] sm:$0xff]   ;;  %v431_v52 = vld [vmem:[%s3751_s8 + $0x4a0] sm:$0xff]  }
  0x2c   : > { %424 = vst [vmem:[%s3756_s9 + $0x190] sm:$0xff] %v423_v50   ;;  %v435_v53 = vld [vmem:[%s3751_s8 + $0x4a8] sm:$0xff]   ;;  %428 = vst [vmem:[%s3756_s9 + $0x198] sm:$0xff] %v427_v51   ;;  %v439_v54 = vld [vmem:[%s3751_s8 + $0x4b0] sm:$0xff]  }
  0x2d   : > { %432 = vst [vmem:[%s3756_s9 + $0x1a0] sm:$0xff] %v431_v52   ;;  %436 = vst [vmem:[%s3756_s9 + $0x1a8] sm:$0xff] %v435_v53   ;;  %v443_v55 = vld [vmem:[%s3751_s8 + $0x4b8] sm:$0xff]   ;;  %v447_v56 = vld [vmem:[%s3751_s8 + $0x4c0] sm:$0xff]  }
  0x2e   : > { %440 = vst [vmem:[%s3756_s9 + $0x1b0] sm:$0xff] %v439_v54   ;;  %444 = vst [vmem:[%s3756_s9 + $0x1b8] sm:$0xff] %v443_v55   ;;  %v451_v57 = vld [vmem:[%s3751_s8 + $0x4c8] sm:$0xff]   ;;  %v455_v58 = vld [vmem:[%s3751_s8 + $0x4d0] sm:$0xff]  }
  0x2f   : > { %448 = vst [vmem:[%s3756_s9 + $0x1c0] sm:$0xff] %v447_v56   ;;  %v459_v59 = vld [vmem:[%s3751_s8 + $0x4d8] sm:$0xff]   ;;  %452 = vst [vmem:[%s3756_s9 + $0x1c8] sm:$0xff] %v451_v57   ;;  %v463_v60 = vld [vmem:[%s3751_s8 + $0x4e0] sm:$0xff]  }
  0x30   : > { %456 = vst [vmem:[%s3756_s9 + $0x1d0] sm:$0xff] %v455_v58   ;;  %460 = vst [vmem:[%s3756_s9 + $0x1d8] sm:$0xff] %v459_v59   ;;  %v467_v61 = vld [vmem:[%s3751_s8 + $0x4e8] sm:$0xff]   ;;  %v471_v62 = vld [vmem:[%s3751_s8 + $0x4f0] sm:$0xff]  }
  0x31   : > { %464 = vst [vmem:[%s3756_s9 + $0x1e0] sm:$0xff] %v463_v60   ;;  %468 = vst [vmem:[%s3756_s9 + $0x1e8] sm:$0xff] %v467_v61   ;;  %v475_v63 = vld [vmem:[%s3751_s8 + $0x4f8] sm:$0xff]  }
  0x32   : > { %472 = vst [vmem:[%s3756_s9 + $0x1f0] sm:$0xff] %v471_v62   ;;  %476 = vst [vmem:[%s3756_s9 + $0x1f8] sm:$0xff] %v475_v63  }
  0x33 PF: > { %p3068_p6 = scmp.ge.s32.totalorder %s3671_s22, 1  ;;  %p765_p7 = scmp.lt.s32.totalorder %s3671_s22, 5 }
  0x35   : > { %p766_p8 = pnand %p3068_p6, %p765_p7 }
  0x36   : > { %s772_s10 = sand.u32 (!%p766_p8), 1, %s3655_s18   ;;  %s3070_s11 = sshll.u32 (!%p766_p8), %s3663_s20, 6 }
  0x37   : > { %769 = sbr.rel (%p766_p8) target bundleno = 956 (0x3bc), region = 77  ;;  %s3069_s12 = sshll.u32 (!%p766_p8), %s772_s10, 9 }
  0x38   : > { %p802_p9 = scmp.lt.s32.totalorder (!%p766_p8), %s3070_s11, 255  ;;  %s3892_s17 = scalar_lea.vmem (!%p766_p8), [#allocation3], %s3069_s12 }
  0x39   : > { %p3072_p10 = scmp.ne.s32.totalorder (!%p766_p8), %s3663_s20, 0 }
  0x3e   : > { %s4710_s11 = smov (!%p802_p9, %s3070_s11), 255  ;;  %811 = sbr.rel (%p3072_p10) target bundleno = 69 (0x45), region = 85 }
  0x3f   : > { %s3071_s13 = sshll.u32 %s4710_s11, 2  ;;  %v3673_v0 = vmov (!%p3072_p10), 0.0  }
  0x40   : > { %s3890_s16 = scalar_lea.vmem %s4697_s1, %s3071_s13  ;;  %812 = vst [vmem:[#allocation2] sm:$0x3] (!%p3072_p10), %v3673_v0 }
  0x45 PF: > { %v3400_v1 = vld [vmem:[%s3892_s17 + $0xc0] sm:$0xff]   ;;  %vm1069_vm0 = vcmask 130048   ;;  %v3385_v24 = vld [vmem:[%s3892_s17 + $0x48] sm:$0xff]   ;;  %vm1914_vm1 = vcmask 130112   ;;  %vm1921_vm2 = vcmask 195712   ;;  %vm1928_vm3 = vcmask 261312  }
  0x46   : > { %v3384_v2 = vld [vmem:[%s3892_s17 + $0x40] sm:$0xff]   ;;  %v3219_v3 = vunpack.c.l.bf16 %v3400_v1  ;;  %v3220_v5 = vunpack.c.h.bf16 %v3400_v1  ;;  %v3160_v27 = vunpack.c.h.bf16 %v3385_v24  ;;  %v3159_v28 = vunpack.c.l.bf16 %v3385_v24  ;;  %v3401_v32 = vld [vmem:[%s3892_s17 + $0xc8] sm:$0xff]   ;;  %p3105_p11 = scmp.ne.s32.totalorder %s3663_s20, 3 }
  0x47   : > { %v3155_v4 = vunpack.c.l.bf16 %v3384_v2  ;;  %v3156_v6 = vunpack.c.h.bf16 %v3384_v2  ;;  %v3416_v7 = vld [vmem:[%s3892_s17 + $0x140] sm:$0xff]   ;;  %v3224_v38 = vunpack.c.h.bf16 %v3401_v32  ;;  %v3223_v39 = vunpack.c.l.bf16 %v3401_v32  ;;  %v3417_v40 = vld [vmem:[%s3892_s17 + $0x148] sm:$0xff]  }
  0x48   : > { %v1214_v8 = vsel %vm1069_vm0, %v3219_v3, 0.0  ;;  %v1217_v10 = vsel %vm1069_vm0, %v3220_v5, 0.0  ;;  %v3284_v12 = vunpack.c.h.bf16 %v3416_v7  ;;  %v3283_v13 = vunpack.c.l.bf16 %v3416_v7  ;;  %v3432_v14 = vld [vmem:[%s3892_s17 + $0x1c0] sm:$0xff]   ;;  %v3433_v50 = vld [vmem:[%s3892_s17 + $0x1c8] sm:$0xff]  }
  0x49   : > { %v1118_v9 = vsel %vm1069_vm0, %v3155_v4, 0.0  ;;  %1215 = vadd.xlane.f32.xlu1 %v1214_v8  ;;  %v1121_v11 = vsel %vm1069_vm0, %v3156_v6, 0.0  ;;  %v3348_v17 = vunpack.c.h.bf16 %v3432_v14  ;;  %v3347_v18 = vunpack.c.l.bf16 %v3432_v14  ;;  %v3122_v19 = vld [vmem:[%s3892_s17] sm:$0xff]   ;;  %v3377_v59 = vld [vmem:[%s3892_s17 + $0x8] sm:$0xff]  }
  0x4a   : > { %1119 = vadd.xlane.f32.xlu0 %v1118_v9  ;;  %v1313_v15 = vsel %vm1069_vm0, %v3284_v12, 0.0  ;;  %v1310_v16 = vsel %vm1069_vm0, %v3283_v13, 0.0  ;;  %v3124_v20 = vunpack.c.h.bf16 %v3122_v19  ;;  %v3123_v21 = vunpack.c.l.bf16 %v3122_v19  ;;  %v3392_v29 = vld [vmem:[%s3892_s17 + $0x80] sm:$0xff]   ;;  %v3393_v60 = vld [vmem:[%s3892_s17 + $0x88] sm:$0xff]  }
  0x4b   : > { %v1409_v22 = vsel %vm1069_vm0, %v3348_v17, 0.0  ;;  %v1406_v23 = vsel %vm1069_vm0, %v3347_v18, 0.0  ;;  %v1127_v30 = vsel %vm1069_vm0, %v3160_v27, 0.0  ;;  %v1124_v31 = vsel %vm1069_vm0, %v3159_v28, 0.0  ;;  %v3408_v35 = vld [vmem:[%s3892_s17 + $0x100] sm:$0xff]   ;;  %v3409_v5 = vld [vmem:[%s3892_s17 + $0x108] sm:$0xff]  }
  0x4c   : > { %v1073_v25 = vsel %vm1069_vm0, %v3124_v20, 0.0  ;;  %v1070_v26 = vsel %vm1069_vm0, %v3123_v21, 0.0  ;;  %v3188_v33 = vunpack.c.h.bf16 %v3392_v29  ;;  %v3187_v34 = vunpack.c.l.bf16 %v3392_v29  ;;  %v3424_v45 = vld [vmem:[%s3892_s17 + $0x180] sm:$0xff]   ;;  %v3402_v20 = vld [vmem:[%s3892_s17 + $0xd0] sm:$0xff]  }
  0x4d   : > { %1218 = vadd.xlane.f32.xlu1 %v1217_v10  ;;  %v1223_v41 = vsel %vm1069_vm0, %v3224_v38, 0.0  ;;  %v1220_v42 = vsel %vm1069_vm0, %v3223_v39, 0.0  ;;  %v3252_v43 = vunpack.c.h.bf16 %v3408_v35  ;;  %v3251_v44 = vunpack.c.l.bf16 %v3408_v35  ;;  %v3425_v10 = vld [vmem:[%s3892_s17 + $0x188] sm:$0xff]   ;;  %v3378_v35 = vld [vmem:[%s3892_s17 + $0x10] sm:$0xff]  }
  0x4e   : > { %1122 = vadd.xlane.f32.xlu0 %v1121_v11  ;;  %v1169_v36 = vsel %vm1069_vm0, %v3188_v33, 0.0  ;;  %v1166_v37 = vsel %vm1069_vm0, %v3187_v34, 0.0  ;;  %v3288_v48 = vunpack.c.h.bf16 %v3417_v40  ;;  %v3287_v49 = vunpack.c.l.bf16 %v3417_v40  ;;  %v3394_v40 = vld [vmem:[%s3892_s17 + $0x90] sm:$0xff]  }
  0x4f   : > { %v1265_v46 = vsel %vm1069_vm0, %v3252_v43, 0.0  ;;  %v1262_v47 = vsel %vm1069_vm0, %v3251_v44, 0.0  ;;  %v3316_v53 = vunpack.c.h.bf16 %v3424_v45  ;;  %v3315_v54 = vunpack.c.l.bf16 %v3424_v45  ;;  %v3410_v45 = vld [vmem:[%s3892_s17 + $0x110] sm:$0xff]  }
  0x50   : > { %v1319_v51 = vsel %vm1069_vm0, %v3288_v48, 0.0  ;;  %v1316_v52 = vsel %vm1069_vm0, %v3287_v49, 0.0  ;;  %v3352_v57 = vunpack.c.h.bf16 %v3433_v50  ;;  %v3351_v58 = vunpack.c.l.bf16 %v3433_v50  ;;  %v3426_v50 = vld [vmem:[%s3892_s17 + $0x190] sm:$0xff]  }
  0x51   : > { %1314 = vadd.xlane.f32.xlu1 %v1313_v15  ;;  %v1361_v55 = vsel %vm1069_vm0, %v3316_v53, 0.0  ;;  %v1358_v56 = vsel %vm1069_vm0, %v3315_v54, 0.0  ;;  %v3128_v63 = vunpack.c.h.bf16 %v3377_v59  ;;  %v3127_v0 = vunpack.c.l.bf16 %v3377_v59  ;;  %v3386_v15 = vld [vmem:[%s3892_s17 + $0x50] sm:$0xff]  }
  0x52   : > { %1311 = vadd.xlane.f32.xlu0 %v1310_v16  ;;  %v1415_v61 = vsel %vm1069_vm0, %v3352_v57, 0.0  ;;  %v1412_v62 = vsel %vm1069_vm0, %v3351_v58, 0.0  ;;  %v3192_v3 = vunpack.c.h.bf16 %v3393_v60  ;;  %v3191_v4 = vunpack.c.l.bf16 %v3393_v60  ;;  %v3403_v60 = vld [vmem:[%s3892_s17 + $0xd8] sm:$0xff]  }
  0x53   : > { %v1079_v1 = vsel %vm1069_vm0, %v3128_v63, 0.0  ;;  %v1076_v2 = vsel %vm1069_vm0, %v3127_v0, 0.0  ;;  %v3256_v8 = vunpack.c.h.bf16 %v3409_v5  ;;  %v3255_v9 = vunpack.c.l.bf16 %v3409_v5 }
  0x54   : > { %v1175_v6 = vsel %vm1069_vm0, %v3192_v3, 0.0  ;;  %v1172_v7 = vsel %vm1069_vm0, %v3191_v4, 0.0  ;;  %v3320_v13 = vunpack.c.h.bf16 %v3425_v10  ;;  %v3319_v14 = vunpack.c.l.bf16 %v3425_v10 }
  0x55   : > { %1410 = vadd.xlane.f32.xlu1 %v1409_v22  ;;  %v1271_v11 = vsel %vm1069_vm0, %v3256_v8, 0.0  ;;  %v1268_v12 = vsel %vm1069_vm0, %v3255_v9, 0.0  ;;  %v3164_v18 = vunpack.c.h.bf16 %v3386_v15  ;;  %v3163_v19 = vunpack.c.l.bf16 %v3386_v15 }
  0x56   : > { %1407 = vadd.xlane.f32.xlu0 %v1406_v23  ;;  %v1367_v16 = vsel %vm1069_vm0, %v3320_v13, 0.0  ;;  %v1364_v17 = vsel %vm1069_vm0, %v3319_v14, 0.0  ;;  %v3228_v23 = vunpack.c.h.bf16 %v3402_v20  ;;  %v3227_v24 = vunpack.c.l.bf16 %v3402_v20 }
  0x57   : > { %v1133_v21 = vsel %vm1069_vm0, %v3164_v18, 0.0  ;;  %v1130_v22 = vsel %vm1069_vm0, %v3163_v19, 0.0  ;;  %v3132_v38 = vunpack.c.h.bf16 %v3378_v35  ;;  %v3131_v39 = vunpack.c.l.bf16 %v3378_v35 }
  0x58   : > { %v1226_v27 = vsel %vm1069_vm0, %v3227_v24, 0.0  ;;  %v3196_v43 = vunpack.c.h.bf16 %v3394_v40  ;;  %v3195_v44 = vunpack.c.l.bf16 %v3394_v40  ;;  %v3260_v48 = vunpack.c.h.bf16 %v3410_v45 }
  0x59   : > { %1074 = vadd.xlane.f32.xlu1 %v1073_v25  ;;  %v3418_v25 = vld [vmem:[%s3892_s17 + $0x150] sm:$0xff]   ;;  %v3259_v49 = vunpack.c.l.bf16 %v3410_v45  ;;  %v3324_v53 = vunpack.c.h.bf16 %v3426_v50  ;;  %v3323_v54 = vunpack.c.l.bf16 %v3426_v50  ;;  %v3232_v63 = vunpack.c.h.bf16 %v3403_v60 }
  0x5a   : > { %1071 = vadd.xlane.f32.xlu0 %v1070_v26  ;;  %v1229_v26 = vsel %vm1069_vm0, %v3228_v23, 0.0  ;;  %v3292_v28 = vunpack.c.h.bf16 %v3418_v25  ;;  %v3291_v29 = vunpack.c.l.bf16 %v3418_v25  ;;  %v3231_v0 = vunpack.c.l.bf16 %v3403_v60 }
  0x5b   : > { %v1370_v57 = vsel %vm1069_vm0, %v3323_v54, 0.0  ;;  %vm1935_vm4 = vcmask 326912   ;;  %vm1942_vm5 = vcmask 392512   ;;  %vm1949_vm6 = vcmask 458112  }
  0x5c   : > { %v1322_v32 = vsel %vm1069_vm0, %v3291_v29, 0.0  ;;  %v1232_v3 = vsel %vm1069_vm0, %v3231_v0, 0.0  ;;  %vm1956_vm7 = vcmask 523712   ;;  %vm1963_vm8 = vcmask 589312  }
  0x5d   : > { %1128 = vadd.xlane.f32.xlu1 %v1127_v30  ;;  %v3434_v30 = vld [vmem:[%s3892_s17 + $0x1d0] sm:$0xff]   ;;  %vm1970_vm9 = vcmask 654912   ;;  %vm1977_vm10 = vcmask 720512   ;;  %vm1984_vm11 = vcmask 786112   ;;  %vm1991_vm12 = vcmask 851712  }
  0x5e   : > { %1125 = vadd.xlane.f32.xlu0 %v1124_v31  ;;  %v1325_v31 = vsel %vm1069_vm0, %v3292_v28, 0.0  ;;  %v3356_v33 = vunpack.c.h.bf16 %v3434_v30  ;;  %v3355_v34 = vunpack.c.l.bf16 %v3434_v30  ;;  %vm1998_vm13 = vcmask 917312  }
  0x5f   : > { %vm2005_vm14 = vcmask 982912   ;;  %vm2012_vm15 = vcmask 1048512  }
  0x61   : > { %1170 = vadd.xlane.f32.xlu1 %v1169_v36  ;;  %v1421_v36 = vsel %vm1069_vm0, %v3356_v33, 0.0 }
  0x62   : > { %1167 = vadd.xlane.f32.xlu0 %v1166_v37  ;;  %v1418_v37 = vsel %vm1069_vm0, %v3355_v34, 0.0 }
  0x65   : > { %1224 = vadd.xlane.f32.xlu1 %v1223_v41  ;;  %v1085_v41 = vsel %vm1069_vm0, %v3132_v38, 0.0 }
  0x66   : > { %1221 = vadd.xlane.f32.xlu0 %v1220_v42  ;;  %v1082_v42 = vsel %vm1069_vm0, %v3131_v39, 0.0 }
  0x69   : > { %1266 = vadd.xlane.f32.xlu1 %v1265_v46  ;;  %v1181_v46 = vsel %vm1069_vm0, %v3196_v43, 0.0 }
  0x6a   : > { %1263 = vadd.xlane.f32.xlu0 %v1262_v47  ;;  %v1178_v47 = vsel %vm1069_vm0, %v3195_v44, 0.0 }
  0x6d   : > { %1320 = vadd.xlane.f32.xlu1 %v1319_v51  ;;  %v1277_v51 = vsel %vm1069_vm0, %v3260_v48, 0.0 }
  0x6e   : > { %1317 = vadd.xlane.f32.xlu0 %v1316_v52  ;;  %v1274_v52 = vsel %vm1069_vm0, %v3259_v49, 0.0 }
  0x71   : > { %1362 = vadd.xlane.f32.xlu1 %v1361_v55  ;;  %v3387_v55 = vld [vmem:[%s3892_s17 + $0x58] sm:$0xff]  }
  0x72   : > { %1359 = vadd.xlane.f32.xlu0 %v1358_v56  ;;  %v1373_v56 = vsel %vm1069_vm0, %v3324_v53, 0.0  ;;  %v3168_v58 = vunpack.c.h.bf16 %v3387_v55  ;;  %v3167_v59 = vunpack.c.l.bf16 %v3387_v55 }
  0x75   : > { %1416 = vadd.xlane.f32.xlu1 %v1415_v61  ;;  %v1139_v61 = vsel %vm1069_vm0, %v3168_v58, 0.0 }
  0x76   : > { %1413 = vadd.xlane.f32.xlu0 %v1412_v62  ;;  %v1136_v62 = vsel %vm1069_vm0, %v3167_v59, 0.0 }
  0x79   : > { %1080 = vadd.xlane.f32.xlu1 %v1079_v1  ;;  %v3419_v1 = vld [vmem:[%s3892_s17 + $0x158] sm:$0xff]  }
  0x7a   : > { %1077 = vadd.xlane.f32.xlu0 %v1076_v2  ;;  %v1235_v2 = vsel %vm1069_vm0, %v3232_v63, 0.0  ;;  %v3296_v4 = vunpack.c.h.bf16 %v3419_v1  ;;  %v3295_v5 = vunpack.c.l.bf16 %v3419_v1  ;;  %v3412_v63 = vld [vmem:[%s3892_s17 + $0x120] sm:$0xff]  }
  0x7c   : > { %v1328_v8 = vsel %vm1069_vm0, %v3295_v5, 0.0  ;;  %v3267_v5 = vunpack.c.l.bf16 %v3412_v63 }
  0x7d   : > { %1176 = vadd.xlane.f32.xlu1 %v1175_v6  ;;  %v3435_v6 = vld [vmem:[%s3892_s17 + $0x1d8] sm:$0xff]  }
  0x7e   : > { %1173 = vadd.xlane.f32.xlu0 %v1172_v7  ;;  %v1331_v7 = vsel %vm1069_vm0, %v3296_v4, 0.0  ;;  %v3360_v9 = vunpack.c.h.bf16 %v3435_v6  ;;  %v3359_v10 = vunpack.c.l.bf16 %v3435_v6  ;;  %v3268_v4 = vunpack.c.h.bf16 %v3412_v63 }
  0x80   : > { %v1424_v13 = vsel %vm1069_vm0, %v3359_v10, 0.0  ;;  %v3428_v10 = vld [vmem:[%s3892_s17 + $0x1a0] sm:$0xff]  }
  0x81   : > { %1272 = vadd.xlane.f32.xlu1 %v1271_v11  ;;  %v3379_v11 = vld [vmem:[%s3892_s17 + $0x18] sm:$0xff]  }
  0x82   : > { %1269 = vadd.xlane.f32.xlu0 %v1268_v12  ;;  %v1427_v12 = vsel %vm1069_vm0, %v3360_v9, 0.0  ;;  %v3136_v14 = vunpack.c.h.bf16 %v3379_v11  ;;  %v3135_v15 = vunpack.c.l.bf16 %v3379_v11 }
  0x84   : > { %v1088_v18 = vsel %vm1069_vm0, %v3135_v15, 0.0 }
  0x85   : > { %1368 = vadd.xlane.f32.xlu1 %v1367_v16  ;;  %v3395_v16 = vld [vmem:[%s3892_s17 + $0x98] sm:$0xff]  }
  0x86   : > { %1365 = vadd.xlane.f32.xlu0 %v1364_v17  ;;  %v1091_v17 = vsel %vm1069_vm0, %v3136_v14, 0.0  ;;  %v3200_v19 = vunpack.c.h.bf16 %v3395_v16  ;;  %v3199_v20 = vunpack.c.l.bf16 %v3395_v16  ;;  %v1289_v16 = vsel %vm1069_vm0, %v3268_v4, 0.0 }
  0x88   : > { %v1184_v23 = vsel %vm1069_vm0, %v3199_v20, 0.0  ;;  %v3389_v20 = vld [vmem:[%s3892_s17 + $0x68] sm:$0xff]  }
  0x89   : > { %1134 = vadd.xlane.f32.xlu1 %v1133_v21  ;;  %v3411_v21 = vld [vmem:[%s3892_s17 + $0x118] sm:$0xff]  }
  0x8a   : > { %1131 = vadd.xlane.f32.xlu0 %v1130_v22  ;;  %v1187_v22 = vsel %vm1069_vm0, %v3200_v19, 0.0  ;;  %v3264_v24 = vunpack.c.h.bf16 %v3411_v21  ;;  %v3263_v25 = vunpack.c.l.bf16 %v3411_v21  ;;  %v3331_v19 = vunpack.c.l.bf16 %v3428_v10 }
  0x8c   : > { %v1280_v28 = vsel %vm1069_vm0, %v3263_v25, 0.0 }
  0x8d   : > { %1230 = vadd.xlane.f32.xlu1 %v1229_v26  ;;  %v3427_v26 = vld [vmem:[%s3892_s17 + $0x198] sm:$0xff]  }
  0x8e   : > { %1227 = vadd.xlane.f32.xlu0 %v1226_v27  ;;  %v1283_v27 = vsel %vm1069_vm0, %v3264_v24, 0.0  ;;  %v3328_v29 = vunpack.c.h.bf16 %v3427_v26  ;;  %v3327_v30 = vunpack.c.l.bf16 %v3427_v26 }
  0x90   : > { %v1376_v33 = vsel %vm1069_vm0, %v3327_v30, 0.0 }
  0x91   : > { %1326 = vadd.xlane.f32.xlu1 %v1325_v31  ;;  %v3388_v31 = vld [vmem:[%s3892_s17 + $0x60] sm:$0xff]  }
  0x92   : > { %1323 = vadd.xlane.f32.xlu0 %v1322_v32  ;;  %v1379_v32 = vsel %vm1069_vm0, %v3328_v29, 0.0  ;;  %v3172_v34 = vunpack.c.h.bf16 %v3388_v31  ;;  %v3171_v35 = vunpack.c.l.bf16 %v3388_v31  ;;  %v1382_v31 = vsel %vm1069_vm0, %v3331_v19, 0.0  ;;  %v3397_v19 = vld [vmem:[%s3892_s17 + $0xa8] sm:$0xff]  }
  0x94   : > { %v1142_v38 = vsel %vm1069_vm0, %v3171_v35, 0.0 }
  0x95   : > { %1422 = vadd.xlane.f32.xlu1 %v1421_v36  ;;  %v3404_v36 = vld [vmem:[%s3892_s17 + $0xe0] sm:$0xff]  }
  0x96   : > { %1419 = vadd.xlane.f32.xlu0 %v1418_v37  ;;  %v1145_v37 = vsel %vm1069_vm0, %v3172_v34, 0.0  ;;  %v3236_v39 = vunpack.c.h.bf16 %v3404_v36  ;;  %v3235_v40 = vunpack.c.l.bf16 %v3404_v36 }
  0x98   : > { %v1238_v43 = vsel %vm1069_vm0, %v3235_v40, 0.0 }
  0x99   : > { %1086 = vadd.xlane.f32.xlu1 %v1085_v41  ;;  %v3420_v41 = vld [vmem:[%s3892_s17 + $0x160] sm:$0xff]  }
  0x9a   : > { %1083 = vadd.xlane.f32.xlu0 %v1082_v42  ;;  %v1241_v42 = vsel %vm1069_vm0, %v3236_v39, 0.0  ;;  %v3300_v44 = vunpack.c.h.bf16 %v3420_v41  ;;  %v3299_v45 = vunpack.c.l.bf16 %v3420_v41 }
  0x9c   : > { %v1334_v48 = vsel %vm1069_vm0, %v3299_v45, 0.0  ;;  %v3421_v45 = vld [vmem:[%s3892_s17 + $0x168] sm:$0xff]  }
  0x9d   : > { %1182 = vadd.xlane.f32.xlu1 %v1181_v46  ;;  %v3436_v46 = vld [vmem:[%s3892_s17 + $0x1e0] sm:$0xff]  }
  0x9e   : > { %1179 = vadd.xlane.f32.xlu0 %v1178_v47  ;;  %v1337_v47 = vsel %vm1069_vm0, %v3300_v44, 0.0  ;;  %v3364_v49 = vunpack.c.h.bf16 %v3436_v46  ;;  %v3363_v50 = vunpack.c.l.bf16 %v3436_v46 }
  0xa0   : > { %v1430_v53 = vsel %vm1069_vm0, %v3363_v50, 0.0 }
  0xa1   : > { %1278 = vadd.xlane.f32.xlu1 %v1277_v51  ;;  %v3380_v51 = vld [vmem:[%s3892_s17 + $0x20] sm:$0xff]  }
  0xa2   : > { %1275 = vadd.xlane.f32.xlu0 %v1274_v52  ;;  %v1433_v52 = vsel %vm1069_vm0, %v3364_v49, 0.0  ;;  %v3140_v54 = vunpack.c.h.bf16 %v3380_v51  ;;  %v3139_v55 = vunpack.c.l.bf16 %v3380_v51 }
  0xa4   : > { %v1097_v59 = vsel %vm1069_vm0, %v3140_v54, 0.0  ;;  %v1094_v60 = vsel %vm1069_vm0, %v3139_v55, 0.0  ;;  %v3304_v54 = vunpack.c.h.bf16 %v3421_v45  ;;  %v3303_v55 = vunpack.c.l.bf16 %v3421_v45 }
  0xa5   : > { %1374 = vadd.xlane.f32.xlu1 %v1373_v56  ;;  %v3396_v56 = vld [vmem:[%s3892_s17 + $0xa0] sm:$0xff]  }
  0xa6   : > { %1371 = vadd.xlane.f32.xlu0 %v1370_v57  ;;  %v1343_v4 = vsel %vm1069_vm0, %v3304_v54, 0.0 }
  0xa9   : > { %1140 = vadd.xlane.f32.xlu1 %v1139_v61  ;;  %v3204_v61 = vunpack.c.h.bf16 %v3396_v56 }
  0xaa   : > { %1137 = vadd.xlane.f32.xlu0 %v1136_v62  ;;  %v3203_v62 = vunpack.c.l.bf16 %v3396_v56  ;;  %v3437_v56 = vld [vmem:[%s3892_s17 + $0x1e8] sm:$0xff]  }
  0xad   : > { %1236 = vadd.xlane.f32.xlu1 %v1235_v2  ;;  %v1193_v2 = vsel %vm1069_vm0, %v3204_v61, 0.0 }
  0xae   : > { %1233 = vadd.xlane.f32.xlu0 %v1232_v3  ;;  %v1190_v3 = vsel %vm1069_vm0, %v3203_v62, 0.0 }
  0xb1   : > { %1332 = vadd.xlane.f32.xlu1 %v1331_v7 }
  0xb2   : > { %1329 = vadd.xlane.f32.xlu0 %v1328_v8 }
  0xb5   : > { %1428 = vadd.xlane.f32.xlu1 %v1427_v12 }
  0xb6   : > { %1425 = vadd.xlane.f32.xlu0 %v1424_v13  ;;  %v1903_v13 = vlaneseq }
  0xb8   : > { %v4025_v34 = vshrl.u32 %v1903_v13, 7 }
  0xb9   : > { %1092 = vadd.xlane.f32.xlu1 %v1091_v17  ;;  %v3332_v17 = vunpack.c.h.bf16 %v3428_v10 }
  0xba   : > { %1089 = vadd.xlane.f32.xlu0 %v1088_v18  ;;  %v1286_v18 = vsel %vm1069_vm0, %v3267_v5, 0.0  ;;  %v1340_v5 = vsel %vm1069_vm0, %v3303_v55, 0.0 }
  0xbd   : > { %1188 = vadd.xlane.f32.xlu1 %v1187_v22 }
  0xbe   : > { %1185 = vadd.xlane.f32.xlu0 %v1184_v23  ;;  %v4018_v23 = vand.u32 127, %v1903_v13 }
  0xc0   : > { %v1909_v36 = vadd.s32 4294967288, %v4018_v23  ;;  %v4035_v46 = vsub.s32 %v4018_v23, %v4025_v34  ;;  %v1923_v49 = vadd.s32 4294967272, %v4018_v23 }
  0xc1   : > { %1284 = vadd.xlane.f32.xlu1 %v1283_v27  ;;  %v1385_v27 = vsel %vm1069_vm0, %v3332_v17, 0.0 }
  0xc2   : > { %1281 = vadd.xlane.f32.xlu0 %v1280_v28  ;;  %v3176_v28 = vunpack.c.h.bf16 %v3389_v20  ;;  %v4042_v50 = vsub.s32 %v1909_v36, %v4025_v34  ;;  %v4053_v63 = vsub.s32 %v1923_v49, %v4025_v34  ;;  %v3207_v49 = vunpack.c.l.bf16 %v3397_v19 }
  0xc4   : > { %v1151_v39 = vsel %vm1069_vm0, %v3176_v28, 0.0 }
  0xc5   : > { %1380 = vadd.xlane.f32.xlu1 %v1379_v32  ;;  %v3175_v32 = vunpack.c.l.bf16 %v3389_v20 }
  0xc6   : > { %1377 = vadd.xlane.f32.xlu0 %v1376_v33  ;;  %v3405_v33 = vld [vmem:[%s3892_s17 + $0xe8] sm:$0xff]  }
  0xc7   : > { %v3240_v40 = vunpack.c.h.bf16 %v3405_v33  ;;  %v3239_v44 = vunpack.c.l.bf16 %v3405_v33  ;;  %v3208_v33 = vunpack.c.h.bf16 %v3397_v19 }
  0xc9   : > { %1146 = vadd.xlane.f32.xlu1 %v1145_v37 }
  0xca   : > { %1143 = vadd.xlane.f32.xlu0 %v1142_v38 }
  0xcd   : > { %1242 = vadd.xlane.f32.xlu1 %v1241_v42 }
  0xce   : > { %1239 = vadd.xlane.f32.xlu0 %v1238_v43  ;;  %v1148_v43 = vsel %vm1069_vm0, %v3175_v32, 0.0 }
  0xd1   : > { %1338 = vadd.xlane.f32.xlu1 %v1337_v47 }
  0xd2   : > { %1335 = vadd.xlane.f32.xlu0 %v1334_v48  ;;  %v1916_v48 = vadd.s32 4294967280, %v4018_v23 }
  0xd4   : > { %v4050_v62 = vsub.s32 %v1916_v48, %v4025_v34 }
  0xd5   : > { %1434 = vadd.xlane.f32.xlu1 %v1433_v52 }
  0xd6   : > { %1431 = vadd.xlane.f32.xlu0 %v1430_v53  ;;  %v1216_v57 = vpop.xlane.xlu1 %1215  ;;  %v1247_v53 = vsel %vm1069_vm0, %v3240_v40, 0.0 }
  0xd7   : > { %v1120_v58 = vpop.xlane.xlu0 %1119  ;;  %v1502_v6 = vmul.f32 0.0625, %v1216_v57 }
  0xd8   : > { %v1470_v7 = vmul.f32 0.0625, %v1120_v58 }
  0xd9   : > { %1098 = vadd.xlane.f32.xlu1 %v1097_v59 }
  0xda   : > { %1095 = vadd.xlane.f32.xlu0 %v1094_v60  ;;  %v1219_v0 = vpop.xlane.xlu1 %1218  ;;  %v1244_v60 = vsel %vm1069_vm0, %v3239_v44, 0.0 }
  0xdb   : > { %v1123_v1 = vpop.xlane.xlu0 %1122  ;;  %v1503_v8 = vmul.f32 0.0625, %v1219_v0  ;;  %v3368_v0 = vunpack.c.h.bf16 %v3437_v56 }
  0xdc   : > { %v1471_v9 = vmul.f32 0.0625, %v1123_v1 }
  0xdd   : > { %v4011_v11 = vpack.c.bf16 %v1503_v8, %v1502_v6  ;;  %1194 = vadd.xlane.f32.xlu1 %v1193_v2  ;;  %v3367_v6 = vunpack.c.l.bf16 %v3437_v56 }
  0xde   : > { %v4013_v12 = vpack.c.bf16 %v1471_v9, %v1470_v7  ;;  %1191 = vadd.xlane.f32.xlu0 %v1190_v3  ;;  %v1315_v14 = vpop.xlane.xlu1 %1314  ;;  %v3381_v7 = vld [vmem:[%s3892_s17 + $0x28] sm:$0xff]  }
  0xdf   : > { %v1312_v15 = vpop.xlane.xlu0 %1311  ;;  %v1535_v21 = vmul.f32 0.0625, %v1315_v14  ;;  %v3144_v17 = vunpack.c.h.bf16 %v3381_v7  ;;  %v1823_v20 = vunpack.c.l.b16 %v4011_v11 }
  0xe0   : > { %v1534_v22 = vmul.f32 0.0625, %v1312_v15  ;;  %v1791_v57 = vunpack.c.l.b16 %v4013_v12  ;;  %v1792_v58 = vunpack.c.h.b16 %v4013_v12 }
  0xe1   : > { %1290 = vadd.xlane.f32.xlu1 %v1289_v16  ;;  %v1439_v16 = vsel %vm1069_vm0, %v3368_v0, 0.0 }
  0xe2   : > { %v4020_v24 = vpack.c.bf16 %v1535_v21, %v1534_v22  ;;  %1287 = vadd.xlane.f32.xlu0 %v1286_v18  ;;  %v1411_v25 = vpop.xlane.xlu1 %1410  ;;  %v2017_v8 = vrot.slane %v1791_v57, %v4035_v46  ;;  %v2021_v9 = vrot.slane %v1792_v58, %v4042_v50  ;;  %v3143_v18 = vunpack.c.l.bf16 %v3381_v7  ;;  %v3429_v57 = vld [vmem:[%s3892_s17 + $0x1a8] sm:$0xff]  }
  0xe3   : > { %v1408_v26 = vpop.xlane.xlu0 %1407  ;;  %v1567_v29 = vmul.f32 0.0625, %v1411_v25  ;;  %v1824_v21 = vunpack.c.h.b16 %v4011_v11 }
  0xe4   : > { %v1566_v30 = vmul.f32 0.0625, %v1408_v26  ;;  %v2022_v28 = vsel %vm1914_vm1, %v2021_v9, %v2017_v8  ;;  %v3336_v8 = vunpack.c.h.bf16 %v3429_v57  ;;  %v3335_v9 = vunpack.c.l.bf16 %v3429_v57 }
  0xe5   : > { %1386 = vadd.xlane.f32.xlu1 %v1385_v27 }
  0xe6   : > { %v4027_v35 = vpack.c.bf16 %v1567_v29, %v1566_v30  ;;  %1383 = vadd.xlane.f32.xlu0 %v1382_v31  ;;  %v1075_v37 = vpop.xlane.xlu1 %1074  ;;  %v1436_v31 = vsel %vm1069_vm0, %v3367_v6, 0.0  ;;  %v3390_v6 = vld [vmem:[%s3892_s17 + $0x70] sm:$0xff]  }
  0xe7   : > { %v1072_v38 = vpop.xlane.xlu0 %1071  ;;  %v1455_v41 = vmul.f32 0.0625, %v1075_v37  ;;  %v2175_v37 = vrot.slane %v1823_v20, %v4035_v46 }
  0xe8   : > { %v1454_v42 = vmul.f32 0.0625, %v1072_v38  ;;  %v2179_v38 = vrot.slane %v1824_v21, %v4042_v50 }
  0xe9   : > { %1152 = vadd.xlane.f32.xlu1 %v1151_v39 }
  0xea   : > { %v4037_v47 = vpack.c.bf16 %v1455_v41, %v1454_v42  ;;  %1149 = vadd.xlane.f32.xlu0 %v1148_v43  ;;  %v1129_v51 = vpop.xlane.xlu1 %1128  ;;  %v1103_v41 = vsel %vm1069_vm0, %v3144_v17, 0.0  ;;  %v1100_v42 = vsel %vm1069_vm0, %v3143_v18, 0.0  ;;  %v3413_v43 = vld [vmem:[%s3892_s17 + $0x128] sm:$0xff]   ;;  %v2180_v58 = vsel %vm1914_vm1, %v2179_v38, %v2175_v37  ;;  %v3438_v37 = vld [vmem:[%s3892_s17 + $0x1f0] sm:$0xff]  }
  0xeb   : > { %v1126_v52 = vpop.xlane.xlu0 %1125  ;;  %v1473_v59 = vmul.f32 0.0625, %v1129_v51  ;;  %v3272_v55 = vunpack.c.h.bf16 %v3413_v43  ;;  %v3271_v56 = vunpack.c.l.bf16 %v3413_v43  ;;  %v3180_v18 = vunpack.c.h.bf16 %v3390_v6 }
  0xec   : > { %v1472_v61 = vmul.f32 0.0625, %v1126_v52  ;;  %v1199_v52 = vsel %vm1069_vm0, %v3208_v33, 0.0  ;;  %v1776_v57 = vunpack.c.h.b16 %v4037_v47 }
  0xed   : > { %1248 = vadd.xlane.f32.xlu1 %v1247_v53  ;;  %v1292_v17 = vsel %vm1069_vm0, %v3271_v56, 0.0  ;;  %v1775_v56 = vunpack.c.l.b16 %v4037_v47 }
  0xee   : > { %v1592_v1 = vpack.c.bf16 %v1473_v59, %v1472_v61  ;;  %1245 = vadd.xlane.f32.xlu0 %v1244_v60  ;;  %v1171_v2 = vpop.xlane.xlu1 %1170  ;;  %v1855_v59 = vunpack.c.l.b16 %v4020_v24  ;;  %v1856_v60 = vunpack.c.h.b16 %v4020_v24  ;;  %v1295_v24 = vsel %vm1069_vm0, %v3272_v55, 0.0 }
  0xef   : > { %v1168_v3 = vpop.xlane.xlu0 %1167  ;;  %v1487_v10 = vmul.f32 0.0625, %v1171_v2 }
  0xf0   : > { %v1486_v12 = vmul.f32 0.0625, %v1168_v3  ;;  %v1793_v13 = vunpack.c.l.b16 %v1592_v1  ;;  %v1794_v14 = vunpack.c.h.b16 %v1592_v1 }
  0xf1   : > { %1344 = vadd.xlane.f32.xlu1 %v1343_v4 }
  0xf2   : > { %v4060_v15 = vpack.c.bf16 %v1487_v10, %v1486_v12  ;;  %v2026_v22 = vrot.slane %v1793_v13, %v4050_v62  ;;  %v2031_v25 = vrot.slane %v1794_v14, %v4053_v63  ;;  %1341 = vadd.xlane.f32.xlu0 %v1340_v5  ;;  %v1225_v26 = vpop.xlane.xlu1 %1224  ;;  %v1196_v5 = vsel %vm1069_vm0, %v3207_v49, 0.0 }
  0xf3   : > { %v1222_v27 = vpop.xlane.xlu0 %1221  ;;  %v1505_v29 = vmul.f32 0.0625, %v1225_v26  ;;  %v2333_v12 = vrot.slane %v1855_v59, %v4035_v46  ;;  %v2337_v13 = vrot.slane %v1856_v60, %v4042_v50  ;;  %v1887_v26 = vunpack.c.l.b16 %v4027_v35 }
  0xf4   : > { %v1504_v30 = vmul.f32 0.0625, %v1222_v27  ;;  %v2027_v32 = vsel %vm1921_vm2, %v2026_v22, %v2022_v28  ;;  %v1391_v27 = vsel %vm1069_vm0, %v3336_v8, 0.0  ;;  %v1388_v28 = vsel %vm1069_vm0, %v3335_v9, 0.0 }
  0xf5   : > { %v4072_v36 = vsel %vm1928_vm3, %v2031_v25, %v2027_v32  ;;  %1440 = vadd.xlane.f32.xlu1 %v1439_v16  ;;  %v3406_v25 = vld [vmem:[%s3892_s17 + $0xf0] sm:$0xff]   ;;  %v2338_v38 = vsel %vm1914_vm1, %v2337_v13, %v2333_v12  ;;  %v1908_v12 = vrot.slane %v1775_v56, %v4035_v46  ;;  %v1913_v13 = vrot.slane %v1776_v57, %v4042_v50 }
  0xf6   : > { %v1608_v11 = vpack.c.bf16 %v1505_v29, %v1504_v30  ;;  %1437 = vadd.xlane.f32.xlu0 %v1436_v31  ;;  %v1267_v39 = vpop.xlane.xlu1 %1266  ;;  %v3179_v29 = vunpack.c.l.bf16 %v3390_v6  ;;  %v3422_v30 = vld [vmem:[%s3892_s17 + $0x170] sm:$0xff]   ;;  %v1888_v31 = vunpack.c.h.b16 %v4027_v35  ;;  %v3243_v43 = vunpack.c.l.bf16 %v3406_v25 }
  0xf7   : > { %v1264_v40 = vpop.xlane.xlu0 %1263  ;;  %v1519_v48 = vmul.f32 0.0625, %v1267_v39 }
  0xf8   : > { %v1825_v44 = vunpack.c.l.b16 %v1608_v11  ;;  %v1826_v45 = vunpack.c.h.b16 %v1608_v11  ;;  %v1518_v51 = vmul.f32 0.0625, %v1264_v40  ;;  %v2495_v55 = vrot.slane %v1888_v31, %v4042_v50 }
  0xf9   : > { %1104 = vadd.xlane.f32.xlu1 %v1103_v41  ;;  %v1157_v41 = vsel %vm1069_vm0, %v3180_v18, 0.0  ;;  %v1808_v18 = vunpack.c.h.b16 %v4060_v15 }
  0xfa   : > { %v2184_v53 = vrot.slane %v1825_v44, %v4050_v62  ;;  %v2189_v54 = vrot.slane %v1826_v45, %v4053_v63  ;;  %v4086_v61 = vpack.c.bf16 %v1519_v48, %v1518_v51  ;;  %1101 = vadd.xlane.f32.xlu0 %v1100_v42  ;;  %v1321_v0 = vpop.xlane.xlu1 %1320  ;;  %v3244_v42 = vunpack.c.h.bf16 %v3406_v25 }
  0xfb   : > { %v1318_v1 = vpop.xlane.xlu0 %1317  ;;  %v1537_v3 = vmul.f32 0.0625, %v1321_v0  ;;  %v3308_v45 = vunpack.c.h.bf16 %v3422_v30  ;;  %v3307_v48 = vunpack.c.l.bf16 %v3422_v30  ;;  %v1154_v0 = vsel %vm1069_vm0, %v3179_v29, 0.0 }
  0xfc   : > { %v2185_v2 = vsel %vm1921_vm2, %v2184_v53, %v2180_v58  ;;  %v1536_v4 = vmul.f32 0.0625, %v1318_v1  ;;  %v3371_v53 = vunpack.c.l.bf16 %v3438_v37  ;;  %v1253_v1 = vsel %vm1069_vm0, %v3244_v42, 0.0 }
  0xfd   : > { %v4092_v7 = vsel %vm1928_vm3, %v2189_v54, %v2185_v2  ;;  %1200 = vadd.xlane.f32.xlu1 %v1199_v52  ;;  %v3372_v52 = vunpack.c.h.bf16 %v3438_v37  ;;  %v2491_v54 = vrot.slane %v1887_v26, %v4035_v46  ;;  %v1250_v2 = vsel %vm1069_vm0, %v3243_v43, 0.0 }
  0xfe   : > { %v1624_v10 = vpack.c.bf16 %v1537_v3, %v1536_v4  ;;  %1197 = vadd.xlane.f32.xlu0 %v1196_v5  ;;  %v1363_v14 = vpop.xlane.xlu1 %1362  ;;  %v1349_v5 = vsel %vm1069_vm0, %v3308_v45, 0.0  ;;  %v1346_v6 = vsel %vm1069_vm0, %v3307_v48, 0.0  ;;  %v1839_v29 = vunpack.c.l.b16 %v4086_v61 }
  0xff   : > { %v1360_v16 = vpop.xlane.xlu0 %1359  ;;  %v1551_v21 = vmul.f32 0.0625, %v1363_v14  ;;  %v4125_v9 = vsel %vm1069_vm0, %v3372_v52, 0.0  ;;  %v1840_v30 = vunpack.c.h.b16 %v4086_v61 }
 0x100   : > { %v1857_v19 = vunpack.c.l.b16 %v1624_v10  ;;  %v1858_v20 = vunpack.c.h.b16 %v1624_v10  ;;  %v1550_v22 = vmul.f32 0.0625, %v1360_v16  ;;  %v4128_v10 = vsel %vm1069_vm0, %v3371_v53, 0.0  ;;  %v3382_v16 = vld [vmem:[%s3892_s17 + $0x30] sm:$0xff]  }
 0x101   : > { %1296 = vadd.xlane.f32.xlu1 %v1295_v24  ;;  %v2496_v24 = vsel %vm1914_vm1, %v2495_v55, %v2491_v54  ;;  %v3147_v43 = vunpack.c.l.bf16 %v3382_v16  ;;  %v1930_v53 = vadd.s32 4294967264, %v4018_v23  ;;  %v2254_v55 = vrot.slane %v1839_v29, %v4035_v46 }
 0x102   : > { %v2342_v32 = vrot.slane %v1857_v19, %v4050_v62  ;;  %v2347_v33 = vrot.slane %v1858_v20, %v4053_v63  ;;  %v4106_v11 = vpack.c.bf16 %v1551_v21, %v1550_v22  ;;  %1293 = vadd.xlane.f32.xlu0 %v1292_v17  ;;  %v1417_v39 = vpop.xlane.xlu1 %1416  ;;  %v1807_v17 = vunpack.c.l.b16 %v4060_v15 }
 0x103   : > { %v1414_v40 = vpop.xlane.xlu0 %1413  ;;  %v1569_v35 = vmul.f32 0.0625, %v1417_v39  ;;  %v1915_v39 = vsel %vm1914_vm1, %v1913_v13, %v1908_v12  ;;  %v2258_v56 = vrot.slane %v1840_v30, %v4042_v50  ;;  %v1937_v12 = vadd.s32 4294967256, %v4018_v23 }
 0x104   : > { %v2343_v44 = vsel %vm1921_vm2, %v2342_v32, %v2338_v38  ;;  %v1568_v51 = vmul.f32 0.0625, %v1414_v40  ;;  %v3148_v32 = vunpack.c.h.bf16 %v3382_v16  ;;  %v2096_v40 = vrot.slane %v1807_v17, %v4035_v46 }
 0x105   : > { %v4113_v49 = vsel %vm1928_vm3, %v2347_v33, %v2343_v44  ;;  %1392 = vadd.xlane.f32.xlu1 %v1391_v27  ;;  %v2259_v17 = vsel %vm1914_vm1, %v2258_v56, %v2254_v55 }
 0x106   : > { %v1640_v58 = vpack.c.bf16 %v1569_v35, %v1568_v51  ;;  %1389 = vadd.xlane.f32.xlu0 %v1388_v28  ;;  %v1081_v59 = vpop.xlane.xlu1 %1080  ;;  %v1109_v54 = vsel %vm1069_vm0, %v3148_v32, 0.0 }
 0x107   : > { %v1078_v60 = vpop.xlane.xlu0 %1077  ;;  %v1457_v3 = vmul.f32 0.0625, %v1081_v59  ;;  %v3398_v59 = vld [vmem:[%s3892_s17 + $0xb0] sm:$0xff]  }
 0x108   : > { %v1456_v4 = vmul.f32 0.0625, %v1078_v60  ;;  %v1889_v8 = vunpack.c.l.b16 %v1640_v58  ;;  %v1890_v47 = vunpack.c.h.b16 %v1640_v58  ;;  %v3212_v16 = vunpack.c.h.bf16 %v3398_v59 }
 0x109   : > { %1158 = vadd.xlane.f32.xlu1 %v1157_v41  ;;  %v2100_v41 = vrot.slane %v1808_v18, %v4042_v50  ;;  %v3211_v18 = vunpack.c.l.bf16 %v3398_v59 }
 0x10a   : > { %v1584_v14 = vpack.c.bf16 %v1457_v3, %v1456_v4  ;;  %v2500_v19 = vrot.slane %v1889_v8, %v4050_v62  ;;  %v2505_v20 = vrot.slane %v1890_v47, %v4053_v63  ;;  %1155 = vadd.xlane.f32.xlu0 %v1154_v0  ;;  %v1177_v21 = vpop.xlane.xlu1 %1176  ;;  %v1871_v0 = vunpack.c.l.b16 %v4106_v11 }
 0x10b   : > { %v1174_v22 = vpop.xlane.xlu0 %1173  ;;  %v1489_v27 = vmul.f32 0.0625, %v1177_v21  ;;  %v2101_v60 = vsel %vm1914_vm1, %v2100_v41, %v2096_v40  ;;  %v1205_v32 = vsel %vm1069_vm0, %v3212_v16, 0.0 }
 0x10c   : > { %v1777_v25 = vunpack.c.l.b16 %v1584_v14  ;;  %v1778_v26 = vunpack.c.h.b16 %v1584_v14  ;;  %v1488_v28 = vmul.f32 0.0625, %v1174_v22  ;;  %v2501_v31 = vsel %vm1921_vm2, %v2500_v19, %v2496_v24 }
 0x10d   : > { %v4142_v15 = vsel %vm1928_vm3, %v2505_v20, %v2501_v31  ;;  %1254 = vadd.xlane.f32.xlu1 %v1253_v1  ;;  %v1872_v1 = vunpack.c.h.b16 %v4106_v11  ;;  %v2412_v19 = vrot.slane %v1871_v0, %v4035_v46  ;;  %v4179_v46 = vsub.s32 %v1930_v53, %v4025_v34 }
 0x10e   : > { %v1920_v33 = vrot.slane %v1777_v25, %v4050_v62  ;;  %v1927_v37 = vrot.slane %v1778_v26, %v4053_v63  ;;  %v1600_v38 = vpack.c.bf16 %v1489_v27, %v1488_v28  ;;  %1251 = vadd.xlane.f32.xlu0 %v1250_v2  ;;  %v1273_v61 = vpop.xlane.xlu1 %1272 }
 0x10f   : > { %v1270_v42 = vpop.xlane.xlu0 %1269  ;;  %v1521_v48 = vmul.f32 0.0625, %v1273_v61  ;;  %v2416_v20 = vrot.slane %v1872_v1, %v4042_v50  ;;  %v4182_v50 = vsub.s32 %v1937_v12, %v4025_v34  ;;  %v1202_v61 = vsel %vm1069_vm0, %v3211_v18, 0.0 }
 0x110   : > { %v1922_v44 = vsel %vm1921_vm2, %v1920_v33, %v1915_v39  ;;  %v1809_v35 = vunpack.c.l.b16 %v1600_v38  ;;  %v1810_v45 = vunpack.c.h.b16 %v1600_v38  ;;  %v1520_v52 = vmul.f32 0.0625, %v1270_v42 }
 0x111   : > { %v4151_v51 = vsel %vm1928_vm3, %v1927_v37, %v1922_v44  ;;  %1350 = vadd.xlane.f32.xlu1 %v1349_v5  ;;  %v2417_v39 = vsel %vm1914_vm1, %v2416_v20, %v2412_v19  ;;  %v3430_v44 = vld [vmem:[%s3892_s17 + $0x1b0] sm:$0xff]   ;;  %vm3675_vm1 = vmmov (!%p3105_p11), 0  }
 0x112   : > { %v2105_v57 = vrot.slane %v1809_v35, %v4050_v62  ;;  %v2110_v58 = vrot.slane %v1810_v45, %v4053_v63  ;;  %v1616_v2 = vpack.c.bf16 %v1521_v48, %v1520_v52  ;;  %1347 = vadd.xlane.f32.xlu0 %v1346_v6  ;;  %v1369_v3 = vpop.xlane.xlu1 %1368  ;;  %v1106_v6 = vsel %vm1069_vm0, %v3147_v43, 0.0 }
 0x113   : > { %v1366_v4 = vpop.xlane.xlu0 %1365  ;;  %v1553_v47 = vmul.f32 0.0625, %v1369_v3  ;;  %v3340_v55 = vunpack.c.h.bf16 %v3430_v44  ;;  %v3339_v56 = vunpack.c.l.bf16 %v3430_v44 }
 0x114   : > { %v2106_v8 = vsel %vm1921_vm2, %v2105_v57, %v2101_v60  ;;  %v1552_v24 = vmul.f32 0.0625, %v1366_v4  ;;  %v1841_v5 = vunpack.c.l.b16 %v1616_v2  ;;  %v1842_v14 = vunpack.c.h.b16 %v1616_v2  ;;  %v3391_v4 = vld [vmem:[%s3892_s17 + $0x78] sm:$0xff]  }
 0x115   : > { %v4166_v13 = vsel %vm1928_vm3, %v2110_v58, %v2106_v8  ;;  %1446 = vadd.xlane.f32.xlu1 %v4125_v9  ;;  %v3414_v9 = vld [vmem:[%s3892_s17 + $0x130] sm:$0xff]   ;;  %v3183_v18 = vunpack.c.l.bf16 %v3391_v4 }
 0x116   : > { %v1632_v11 = vpack.c.bf16 %v1553_v47, %v1552_v24  ;;  %v2263_v21 = vrot.slane %v1841_v5, %v4050_v62  ;;  %v2268_v22 = vrot.slane %v1842_v14, %v4053_v63  ;;  %1443 = vadd.xlane.f32.xlu0 %v4128_v10  ;;  %v1135_v25 = vpop.xlane.xlu1 %1134  ;;  %v3276_v42 = vunpack.c.h.bf16 %v3414_v9 }
 0x117   : > { %v1132_v26 = vpop.xlane.xlu0 %1131  ;;  %v1475_v29 = vmul.f32 0.0625, %v1135_v25  ;;  %v3275_v43 = vunpack.c.l.bf16 %v3414_v9  ;;  %v1397_v5 = vsel %vm1069_vm0, %v3340_v55, 0.0  ;;  %v1394_v14 = vsel %vm1069_vm0, %v3339_v56, 0.0  ;;  %v3407_v25 = vld [vmem:[%s3892_s17 + $0xf8] sm:$0xff]  }
 0x118   : > { %v1873_v27 = vunpack.c.l.b16 %v1632_v11  ;;  %v1874_v28 = vunpack.c.h.b16 %v1632_v11  ;;  %v1474_v30 = vmul.f32 0.0625, %v1132_v26  ;;  %v2264_v31 = vsel %vm1921_vm2, %v2263_v21, %v2259_v17 }
 0x119   : > { %v4186_v10 = vsel %vm1928_vm3, %v2268_v22, %v2264_v31  ;;  %1110 = vadd.xlane.f32.xlu1 %v1109_v54  ;;  %v1301_v60 = vsel %vm1069_vm0, %v3276_v42, 0.0  ;;  %v1298_v3 = vsel %vm1069_vm0, %v3275_v43, 0.0 }
 0x11a   : > { %v2421_v33 = vrot.slane %v1873_v27, %v4050_v62  ;;  %v2426_v37 = vrot.slane %v1874_v28, %v4053_v63  ;;  %v1593_v38 = vpack.c.bf16 %v1475_v29, %v1474_v30  ;;  %1107 = vadd.xlane.f32.xlu0 %v1106_v6  ;;  %v1231_v40 = vpop.xlane.xlu1 %1230  ;;  %v3184_v6 = vunpack.c.h.bf16 %v3391_v4 }
 0x11b   : > { %v1228_v41 = vpop.xlane.xlu0 %1227  ;;  %v1507_v52 = vmul.f32 0.0625, %v1231_v40 }
 0x11c   : > { %v2422_v35 = vsel %vm1921_vm2, %v2421_v33, %v2417_v39  ;;  %v1795_v45 = vunpack.c.l.b16 %v1593_v38  ;;  %v1796_v48 = vunpack.c.h.b16 %v1593_v38  ;;  %v1506_v63 = vmul.f32 0.0625, %v1228_v41  ;;  %v3423_v39 = vld [vmem:[%s3892_s17 + $0x178] sm:$0xff]  }
 0x11d   : > { %v4195_v62 = vsel %vm1928_vm3, %v2426_v37, %v2422_v35  ;;  %1206 = vadd.xlane.f32.xlu1 %v1205_v32  ;;  %v1163_v32 = vsel %vm1069_vm0, %v3184_v6, 0.0  ;;  %v1160_v33 = vsel %vm1069_vm0, %v3183_v18, 0.0  ;;  %v3248_v37 = vunpack.c.h.bf16 %v3407_v25 }
 0x11e   : > { %v2036_v53 = vrot.slane %v1795_v45, %v4179_v46  ;;  %v2041_v54 = vrot.slane %v1796_v48, %v4182_v50  ;;  %v1609_v57 = vpack.c.bf16 %v1507_v52, %v1506_v63  ;;  %1203 = vadd.xlane.f32.xlu0 %v1202_v61  ;;  %v1327_v58 = vpop.xlane.xlu1 %1326  ;;  %v3247_v38 = vunpack.c.l.bf16 %v3407_v25 }
 0x11f   : > { %v1324_v59 = vpop.xlane.xlu0 %1323  ;;  %v1539_v1 = vmul.f32 0.0625, %v1327_v58  ;;  %v3312_v45 = vunpack.c.h.bf16 %v3423_v39  ;;  %v3311_v48 = vunpack.c.l.bf16 %v3423_v39  ;;  %v3439_v58 = vld [vmem:[%s3892_s17 + $0x1f8] sm:$0xff]   ;;  %v1944_v39 = vadd.s32 4294967248, %v4018_v23 }
 0x120   : > { %v2037_v0 = vsel %vm1935_vm4, %v2036_v53, %v4072_v36  ;;  %v1538_v2 = vmul.f32 0.0625, %v1324_v59  ;;  %v1827_v47 = vunpack.c.l.b16 %v1609_v57  ;;  %v1828_v24 = vunpack.c.h.b16 %v1609_v57 }
 0x121   : > { %v4205_v8 = vsel %vm1942_vm5, %v2041_v54, %v2037_v0  ;;  %1302 = vadd.xlane.f32.xlu1 %v1301_v60  ;;  %v1256_v57 = vsel %vm1069_vm0, %v3247_v38, 0.0 }
 0x122   : > { %v1625_v12 = vpack.c.bf16 %v1539_v1, %v1538_v2  ;;  %v2194_v16 = vrot.slane %v1827_v47, %v4179_v46  ;;  %v2199_v36 = vrot.slane %v1828_v24, %v4182_v50  ;;  %1299 = vadd.xlane.f32.xlu0 %v1298_v3  ;;  %v1423_v17 = vpop.xlane.xlu1 %1422  ;;  %v1355_v2 = vsel %vm1069_vm0, %v3312_v45, 0.0 }
 0x123   : > { %v1420_v11 = vpop.xlane.xlu0 %1419  ;;  %v1571_v21 = vmul.f32 0.0625, %v1423_v17  ;;  %v1352_v3 = vsel %vm1069_vm0, %v3311_v48, 0.0 }
 0x124   : > { %v1859_v19 = vunpack.c.l.b16 %v1625_v12  ;;  %v1860_v20 = vunpack.c.h.b16 %v1625_v12  ;;  %v1570_v22 = vmul.f32 0.0625, %v1420_v11  ;;  %v2195_v26 = vsel %vm1935_vm4, %v2194_v16, %v4092_v7  ;;  %v3383_v11 = vld [vmem:[%s3892_s17 + $0x38] sm:$0xff]  }
 0x125   : > { %v4215_v27 = vsel %vm1942_vm5, %v2199_v36, %v2195_v26  ;;  %1398 = vadd.xlane.f32.xlu1 %v1397_v5  ;;  %v3376_v12 = vunpack.c.h.bf16 %v3439_v58  ;;  %v3375_v5 = vunpack.c.l.bf16 %v3439_v58 }
 0x126   : > { %v2352_v28 = vrot.slane %v1859_v19, %v4179_v46  ;;  %v2357_v29 = vrot.slane %v1860_v20, %v4182_v50  ;;  %v1641_v30 = vpack.c.bf16 %v1571_v21, %v1570_v22  ;;  %1395 = vadd.xlane.f32.xlu0 %v1394_v14  ;;  %v1087_v9 = vpop.xlane.xlu1 %1086 }
 0x127   : > { %v1084_v31 = vpop.xlane.xlu0 %1083  ;;  %v1459_v61 = vmul.f32 0.0625, %v1087_v9  ;;  %v1451_v26 = vsel %vm1069_vm0, %v3376_v12, 0.0  ;;  %v3399_v9 = vld [vmem:[%s3892_s17 + $0xb8] sm:$0xff]  }
 0x128   : > { %v2353_v7 = vsel %vm1935_vm4, %v2352_v28, %v4113_v49  ;;  %v1891_v40 = vunpack.c.l.b16 %v1641_v30  ;;  %v1892_v41 = vunpack.c.h.b16 %v1641_v30  ;;  %v1458_v43 = vmul.f32 0.0625, %v1084_v31 }
 0x129   : > { %v4225_v42 = vsel %vm1942_vm5, %v2357_v29, %v2353_v7  ;;  %1164 = vadd.xlane.f32.xlu1 %v1163_v32  ;;  %v1259_v49 = vsel %vm1069_vm0, %v3248_v37, 0.0  ;;  %v1448_v28 = vsel %vm1069_vm0, %v3375_v5, 0.0  ;;  %v3152_v29 = vunpack.c.h.bf16 %v3383_v11 }
 0x12a   : > { %v2510_v44 = vrot.slane %v1891_v40, %v4179_v46  ;;  %v2515_v35 = vrot.slane %v1892_v41, %v4182_v50  ;;  %v1585_v52 = vpack.c.bf16 %v1459_v61, %v1458_v43  ;;  %1161 = vadd.xlane.f32.xlu0 %v1160_v33  ;;  %v1183_v63 = vpop.xlane.xlu1 %1182  ;;  %v3151_v30 = vunpack.c.l.bf16 %v3383_v11 }
 0x12b   : > { %v1180_v53 = vpop.xlane.xlu0 %1179  ;;  %v1491_v55 = vmul.f32 0.0625, %v1183_v63  ;;  %v1951_v7 = vadd.s32 4294967240, %v4018_v23  ;;  %v3216_v61 = vunpack.c.h.bf16 %v3399_v9  ;;  %v3215_v43 = vunpack.c.l.bf16 %v3399_v9 }
 0x12c   : > { %v2511_v54 = vsel %vm1935_vm4, %v2510_v44, %v4142_v15  ;;  %v1490_v56 = vmul.f32 0.0625, %v1180_v53  ;;  %v1779_v60 = vunpack.c.l.b16 %v1585_v52  ;;  %v1780_v0 = vunpack.c.h.b16 %v1585_v52 }
 0x12d   : > { %v4235_v59 = vsel %vm1942_vm5, %v2515_v35, %v2511_v54  ;;  %1260 = vadd.xlane.f32.xlu1 %v1259_v49  ;;  %v1115_v45 = vsel %vm1069_vm0, %v3152_v29, 0.0  ;;  %v1112_v53 = vsel %vm1069_vm0, %v3151_v30, 0.0  ;;  %v3415_v49 = vld [vmem:[%s3892_s17 + $0x138] sm:$0xff]   ;;  %v4273_v58 = vsub.s32 %v1951_v7, %v4025_v34 }
 0x12e   : > { %v1601_v1 = vpack.c.bf16 %v1491_v55, %v1490_v56  ;;  %v1934_v4 = vrot.slane %v1779_v60, %v4179_v46  ;;  %v1941_v15 = vrot.slane %v1780_v0, %v4182_v50  ;;  %1257 = vadd.xlane.f32.xlu0 %v1256_v57  ;;  %v1279_v47 = vpop.xlane.xlu1 %1278  ;;  %v4270_v57 = vsub.s32 %v1944_v39, %v4025_v34  ;;  %v3568_v39 = vld [vmem:[%s3890_s16 + $0x80] sm:$0xff]  }
 0x12f   : > { %v1276_v24 = vpop.xlane.xlu0 %1275  ;;  %v1523_v36 = vmul.f32 0.0625, %v1279_v47  ;;  %v1208_v0 = vsel %vm1069_vm0, %v3215_v43, 0.0  ;;  %v3279_v47 = vunpack.c.l.bf16 %v3415_v49 }
 0x130   : > { %v1811_v14 = vunpack.c.l.b16 %v1601_v1  ;;  %v1812_v16 = vunpack.c.h.b16 %v1601_v1  ;;  %v1522_v17 = vmul.f32 0.0625, %v1276_v24  ;;  %v1936_v6 = vsel %vm1935_vm4, %v1934_v4, %v4151_v51 }
 0x131   : > { %v4245_v18 = vsel %vm1942_vm5, %v1941_v15, %v1936_v6  ;;  %1356 = vadd.xlane.f32.xlu1 %v1355_v2  ;;  %v3280_v15 = vunpack.c.h.bf16 %v3415_v49 }
 0x132   : > { %v2115_v19 = vrot.slane %v1811_v14, %v4179_v46  ;;  %v2120_v20 = vrot.slane %v1812_v16, %v4182_v50  ;;  %v1617_v21 = vpack.c.bf16 %v1523_v36, %v1522_v17  ;;  %1353 = vadd.xlane.f32.xlu0 %v1352_v3  ;;  %v1375_v22 = vpop.xlane.xlu1 %1374  ;;  %v3431_v16 = vld [vmem:[%s3892_s17 + $0x1b8] sm:$0xff]  }
 0x133   : > { %v1372_v25 = vpop.xlane.xlu0 %1371  ;;  %v1555_v33 = vmul.f32 0.0625, %v1375_v22  ;;  %v3563_v36 = vld [vmem:[%s3890_s16 + $0x40] sm:$0xff]   ;;  %v1304_v22 = vsel %vm1069_vm0, %v3279_v47, 0.0  ;;  %v3573_v47 = vld [vmem:[%s3890_s16 + $0x58] sm:$0xff]  }
 0x134   : > { %v2116_v51 = vsel %vm1935_vm4, %v2115_v19, %v4166_v13  ;;  %v1843_v31 = vunpack.c.l.b16 %v1617_v21  ;;  %v1844_v32 = vunpack.c.h.b16 %v1617_v21  ;;  %v1554_v38 = vmul.f32 0.0625, %v1372_v25  ;;  %3440 = vmatprep.subr.bf16.mxu0 %v3563_v36 }
 0x135   : > { %v4255_v37 = vsel %vm1942_vm5, %v2120_v20, %v2116_v51  ;;  %1452 = vadd.xlane.f32.xlu1 %v1451_v26  ;;  %v3344_v25 = vunpack.c.h.bf16 %v3431_v16  ;;  %v3343_v26 = vunpack.c.l.bf16 %v3431_v16  ;;  %v3565_v51 = vld [vmem:[%s3890_s16 + $0x48] sm:$0xff]  }
 0x136   : > { %v2273_v40 = vrot.slane %v1843_v31, %v4179_v46  ;;  %v2278_v41 = vrot.slane %v1844_v32, %v4182_v50  ;;  %v1633_v13 = vpack.c.bf16 %v1555_v33, %v1554_v38  ;;  %1449 = vadd.xlane.f32.xlu0 %v1448_v28  ;;  %v1141_v44 = vpop.xlane.xlu1 %1140  ;;  %v3566_v31 = vld [vmem:[%s3890_s16 + $0xc0] sm:$0xff]   ;;  %v3567_v38 = vld [vmem:[%s3890_s16 + $0x8] sm:$0xff]  }
 0x137   : > { %v1138_v35 = vpop.xlane.xlu0 %1137  ;;  %v1477_v52 = vmul.f32 0.0625, %v1141_v44  ;;  %v1403_v43 = vsel %vm1069_vm0, %v3344_v25, 0.0  ;;  %3462 = vmatprep.subr.bf16.mxu1 %v3566_v31 }
 0x138   : > { %v2274_v48 = vsel %vm1935_vm4, %v2273_v40, %v4186_v10  ;;  %v1476_v63 = vmul.f32 0.0625, %v1138_v35  ;;  %v1875_v55 = vunpack.c.l.b16 %v1633_v13  ;;  %v1876_v56 = vunpack.c.h.b16 %v1633_v13  ;;  %3463 = vmatpush3.bf16.msra.mxu1 %v3568_v39 }
 0x139   : > { %v4267_v54 = vsel %vm1942_vm5, %v2278_v41, %v2274_v48  ;;  %1116 = vadd.xlane.f32.xlu1 %v1115_v45  ;;  %v1211_v10 = vsel %vm1069_vm0, %v3216_v61, 0.0  ;;  %v1400_v45 = vsel %vm1069_vm0, %v3343_v26, 0.0  ;;  %v3569_v48 = vld [vmem:[%s3890_s16 + $0x50] sm:$0xff]  }
 0x13a   : > { %v1594_v60 = vpack.c.bf16 %v1477_v52, %v1476_v63  ;;  %v2431_v1 = vrot.slane %v1875_v55, %v4179_v46  ;;  %v2436_v2 = vrot.slane %v1876_v56, %v4182_v50  ;;  %1113 = vadd.xlane.f32.xlu0 %v1112_v53  ;;  %v1237_v3 = vpop.xlane.xlu1 %1236  ;;  %v3564_v46 = vld [vmem:[%s3890_s16] sm:$0xff]   ;;  %v3570_v52 = vld [vmem:[%s3890_s16 + $0xc8] sm:$0xff]   ;;  %v3571_v55 = vld [vmem:[%s3890_s16 + $0x10] sm:$0xff]  }
 0x13b   : > { %v1234_v4 = vpop.xlane.xlu0 %1233  ;;  %v1509_v5 = vmul.f32 0.0625, %v1237_v3  ;;  %3441 = vmatpush3.bf16.msra.mxu0 %v3564_v46  ;;  %v3572_v56 = vld [vmem:[%s3890_s16 + $0x88] sm:$0xff]   ;;  %3464 = vmatprep.subr.bf16.mxu1 %v3570_v52 }
 0x13c   : > { %v1797_v24 = vunpack.c.l.b16 %v1594_v60  ;;  %v1798_v12 = vunpack.c.h.b16 %v1594_v60  ;;  %v1508_v14 = vmul.f32 0.0625, %v1234_v4  ;;  %v2432_v17 = vsel %vm1935_vm4, %v2431_v1, %v4195_v62  ;;  %3442 = vmatprep.subr.bf16.mxu0 %v3565_v51  ;;  %3465 = vmatpush3.bf16.msra.mxu1 %v3572_v56  ;;  %v3585_v56 = vld [vmem:[%s3890_s16 + $0x70] sm:$0xff]  }
 0x13d   : > { %v4285_v11 = vsel %vm1942_vm5, %v2436_v2, %v2432_v17  ;;  %1212 = vadd.xlane.f32.xlu1 %v1211_v10  ;;  %v1307_v62 = vsel %vm1069_vm0, %v3280_v15, 0.0  ;;  %vm2567_vm0 = vcmask 1041409  }
 0x13e   : > { %v2046_v50 = vrot.slane %v1797_v24, %v4270_v57  ;;  %v2051_v6 = vrot.slane %v1798_v12, %v4273_v58  ;;  %v1610_v19 = vpack.c.bf16 %v1509_v5, %v1508_v14  ;;  %1209 = vadd.xlane.f32.xlu0 %v1208_v0  ;;  %v1333_v20 = vpop.xlane.xlu1 %1332  ;;  %v3574_v24 = vld [vmem:[%s3890_s16 + $0xd0] sm:$0xff]   ;;  %v3575_v5 = vld [vmem:[%s3890_s16 + $0x18] sm:$0xff]  }
 0x13f   : > { %v1330_v21 = vpop.xlane.xlu0 %1329  ;;  %v1541_v9 = vmul.f32 0.0625, %v1333_v20  ;;  %3443 = vmatpush3.bf16.msra.mxu0 %v3567_v38  ;;  %v3576_v14 = vld [vmem:[%s3890_s16 + $0x90] sm:$0xff]   ;;  %3466 = vmatprep.subr.bf16.mxu1 %v3574_v24 }
 0x140   : > { %v2047_v28 = vsel %vm1949_vm6, %v2046_v50, %v4205_v8  ;;  %v1829_v29 = vunpack.c.l.b16 %v1610_v19  ;;  %v1830_v30 = vunpack.c.h.b16 %v1610_v19  ;;  %v1540_v33 = vmul.f32 0.0625, %v1330_v21  ;;  %3444 = vmatprep.subr.bf16.mxu0 %v3569_v48  ;;  %3467 = vmatpush3.bf16.msra.mxu1 %v3576_v14 }
 0x141   : > { %v4296_v32 = vsel %vm1956_vm7, %v2051_v6, %v2047_v28  ;;  %1308 = vadd.xlane.f32.xlu1 %v1307_v62  ;;  %v3577_v62 = vld [vmem:[%s3890_s16 + $0x60] sm:$0xff]  }
 0x142   : > { %v2204_v7 = vrot.slane %v1829_v29, %v4270_v57  ;;  %v2209_v40 = vrot.slane %v1830_v30, %v4273_v58  ;;  %v1626_v8 = vpack.c.bf16 %v1541_v9, %v1540_v33  ;;  %1305 = vadd.xlane.f32.xlu0 %v1304_v22  ;;  %v1429_v41 = vpop.xlane.xlu1 %1428  ;;  %v3578_v22 = vld [vmem:[%s3890_s16 + $0xd8] sm:$0xff]   ;;  %v3579_v28 = vld [vmem:[%s3890_s16 + $0x20] sm:$0xff]  }
 0x143   : > { %v1426_v61 = vpop.xlane.xlu0 %1425  ;;  %v1573_v44 = vmul.f32 0.0625, %v1429_v41  ;;  %3445 = vmatpush3.bf16.msra.mxu0 %v3571_v55  ;;  %v3580_v29 = vld [vmem:[%s3890_s16 + $0x98] sm:$0xff]   ;;  %3468 = vmatprep.subr.bf16.mxu1 %v3578_v22 }
 0x144   : > { %v2205_v13 = vsel %vm1949_vm6, %v2204_v7, %v4215_v27  ;;  %v1572_v35 = vmul.f32 0.0625, %v1426_v61  ;;  %v1861_v53 = vunpack.c.l.b16 %v1626_v8  ;;  %v1862_v49 = vunpack.c.h.b16 %v1626_v8  ;;  %3446 = vmatprep.subr.bf16.mxu0 %v3573_v47  ;;  %3469 = vmatpush3.bf16.msra.mxu1 %v3580_v29  ;;  %v3581_v7 = vld [vmem:[%s3890_s16 + $0x68] sm:$0xff]  }
 0x145   : > { %v4309_v63 = vsel %vm1956_vm7, %v2209_v40, %v2205_v13  ;;  %1404 = vadd.xlane.f32.xlu1 %v1403_v43  ;;  %v3582_v40 = vld [vmem:[%s3890_s16 + $0xe0] sm:$0xff]   ;;  %v3583_v43 = vld [vmem:[%s3890_s16 + $0x28] sm:$0xff]   ;;  %v1958_v47 = vadd.s32 4294967232, %v4018_v23 }
 0x146   : > { %v1642_v60 = vpack.c.bf16 %v1573_v44, %v1572_v35  ;;  %v2362_v27 = vrot.slane %v1861_v53, %v4270_v57  ;;  %v2367_v10 = vrot.slane %v1862_v49, %v4273_v58  ;;  %1401 = vadd.xlane.f32.xlu0 %v1400_v45  ;;  %v1093_v0 = vpop.xlane.xlu1 %1092  ;;  %v3584_v13 = vld [vmem:[%s3890_s16 + $0xa0] sm:$0xff]   ;;  %3470 = vmatprep.subr.bf16.mxu1 %v3582_v40 }
 0x147   : > { %v1090_v1 = vpop.xlane.xlu0 %1089  ;;  %v1461_v4 = vmul.f32 0.0625, %v1093_v0  ;;  %3447 = vmatpush3.bf16.msra.mxu0 %v3575_v5  ;;  %v3588_v0 = vld [vmem:[%s3890_s16 + $0xa8] sm:$0xff]  }
 0x148   : > { %v1893_v2 = vunpack.c.l.b16 %v1642_v60  ;;  %v1894_v3 = vunpack.c.h.b16 %v1642_v60  ;;  %v1460_v15 = vmul.f32 0.0625, %v1090_v1  ;;  %v2363_v12 = vsel %vm1949_vm6, %v2362_v27, %v4225_v42  ;;  %3448 = vmatprep.subr.bf16.mxu0 %v3577_v62  ;;  %3471 = vmatpush3.bf16.msra.mxu1 %v3584_v13  ;;  %v3586_v60 = vld [vmem:[%s3890_s16 + $0xe8] sm:$0xff]  }
 0x149   : > { %v4322_v16 = vsel %vm1956_vm7, %v2367_v10, %v2363_v12  ;;  %v3587_v10 = vld [vmem:[%s3890_s16 + $0x30] sm:$0xff]   ;;  %3472 = vmatprep.subr.bf16.mxu1 %v3586_v60 }
 0x14a   : > { %v2520_v36 = vrot.slane %v1893_v2, %v4270_v57  ;;  %v2525_v17 = vrot.slane %v1894_v3, %v4273_v58  ;;  %v1586_v46 = vpack.c.bf16 %v1461_v4, %v1460_v15  ;;  %v1189_v50 = vpop.xlane.xlu1 %1188 }
 0x14b   : > { %v1186_v6 = vpop.xlane.xlu0 %1185  ;;  %v1493_v21 = vmul.f32 0.0625, %v1189_v50  ;;  %3449 = vmatpush3.bf16.msra.mxu0 %v3579_v28 }
 0x14c   : > { %v2521_v42 = vsel %vm1949_vm6, %v2520_v36, %v4235_v59  ;;  %v1781_v19 = vunpack.c.l.b16 %v1586_v46  ;;  %v1782_v20 = vunpack.c.h.b16 %v1586_v46  ;;  %v1492_v26 = vmul.f32 0.0625, %v1186_v6  ;;  %3450 = vmatprep.subr.bf16.mxu0 %v3581_v7  ;;  %3473 = vmatpush3.bf16.msra.mxu1 %v3588_v0  ;;  %v3590_v46 = vld [vmem:[%s3890_s16 + $0xf0] sm:$0xff]  }
 0x14d   : > { %v4331_v25 = vsel %vm1956_vm7, %v2525_v17, %v2521_v42  ;;  %v3589_v17 = vld [vmem:[%s3890_s16 + $0x78] sm:$0xff]   ;;  %3474 = vmatprep.subr.bf16.mxu1 %v3590_v46 }
 0x14e   : > { %v1948_v30 = vrot.slane %v1781_v19, %v4270_v57  ;;  %v1955_v9 = vrot.slane %v1782_v20, %v4273_v58  ;;  %v1602_v59 = vpack.c.bf16 %v1493_v21, %v1492_v26  ;;  %v1285_v51 = vpop.xlane.xlu1 %1284  ;;  %v3591_v42 = vld [vmem:[%s3890_s16 + $0x38] sm:$0xff]   ;;  %v3592_v19 = vld [vmem:[%s3890_s16 + $0xb0] sm:$0xff]  }
 0x14f   : > { %v1282_v31 = vpop.xlane.xlu0 %1281  ;;  %v1525_v38 = vmul.f32 0.0625, %v1285_v51  ;;  %3451 = vmatpush3.bf16.msra.mxu0 %v3583_v43 }
 0x150   : > { %v1950_v33 = vsel %vm1949_vm6, %v1948_v30, %v4245_v18  ;;  %v1524_v39 = vmul.f32 0.0625, %v1282_v31  ;;  %v1813_v41 = vunpack.c.l.b16 %v1602_v59  ;;  %v1814_v61 = vunpack.c.h.b16 %v1602_v59  ;;  %3452 = vmatprep.subr.bf16.mxu0 %v3585_v56  ;;  %3475 = vmatpush3.bf16.msra.mxu1 %v3592_v19  ;;  %v3594_v31 = vld [vmem:[%s3890_s16 + $0xb8] sm:$0xff]  }
 0x151   : > { %v4342_v8 = vsel %vm1956_vm7, %v1955_v9, %v1950_v33 }
 0x152   : > { %v1618_v44 = vpack.c.bf16 %v1525_v38, %v1524_v39  ;;  %v2125_v18 = vrot.slane %v1813_v41, %v4270_v57  ;;  %v2130_v35 = vrot.slane %v1814_v61, %v4273_v58  ;;  %v1381_v45 = vpop.xlane.xlu1 %1380 }
 0x153   : > { %v1378_v48 = vpop.xlane.xlu0 %1377  ;;  %v1557_v49 = vmul.f32 0.0625, %v1381_v45  ;;  %3453 = vmatpush3.bf16.msra.mxu0 %v3587_v10 }
 0x154   : > { %v1845_v52 = vunpack.c.l.b16 %v1618_v44  ;;  %v1846_v53 = vunpack.c.h.b16 %v1618_v44  ;;  %v1556_v55 = vmul.f32 0.0625, %v1378_v48  ;;  %v2126_v27 = vsel %vm1949_vm6, %v2125_v18, %v4255_v37  ;;  %3454 = vmatprep.subr.bf16.mxu0 %v3589_v17 }
 0x155   : > { %v4355_v1 = vsel %vm1956_vm7, %v2130_v35, %v2126_v27  ;;  %v1965_v37 = vadd.s32 4294967224, %v4018_v23 }
 0x156   : > { %v2283_v2 = vrot.slane %v1845_v52, %v4270_v57  ;;  %v2288_v3 = vrot.slane %v1846_v53, %v4273_v58  ;;  %v1634_v4 = vpack.c.bf16 %v1557_v49, %v1556_v55  ;;  %v1147_v15 = vpop.xlane.xlu1 %1146 }
 0x157   : > { %v1144_v24 = vpop.xlane.xlu0 %1143  ;;  %v1479_v36 = vmul.f32 0.0625, %v1147_v15  ;;  %v4376_v62 = vsub.s32 %v1965_v37, %v4025_v34  ;;  %3455 = vmatpush3.bf16.msra.mxu0 %v3591_v42 }
 0x158   : > { %v2284_v12 = vsel %vm1949_vm6, %v2283_v2, %v4267_v54  ;;  %v1877_v5 = vunpack.c.l.b16 %v1634_v4  ;;  %v1878_v14 = vunpack.c.h.b16 %v1634_v4  ;;  %v1478_v6 = vmul.f32 0.0625, %v1144_v24 }
 0x159   : > { %v4366_v50 = vsel %vm1956_vm7, %v2288_v3, %v2284_v12  ;;  %v4373_v54 = vsub.s32 %v1958_v47, %v4025_v34 }
 0x15a   : > { %v2441_v20 = vrot.slane %v1877_v5, %v4270_v57  ;;  %v2446_v21 = vrot.slane %v1878_v14, %v4273_v58  ;;  %v1595_v22 = vpack.c.bf16 %v1479_v36, %v1478_v6  ;;  %v1243_v26 = vpop.xlane.xlu1 %1242  ;;  %v3593_v57 = vld [vmem:[%s3890_s16 + $0xf8] sm:$0xff]  }
 0x15b   : > { %v1240_v28 = vpop.xlane.xlu0 %1239  ;;  %v1511_v30 = vmul.f32 0.0625, %v1243_v26  ;;  %3476 = vmatprep.subr.bf16.mxu1 %v3593_v57 }
 0x15c   : > { %v2442_v29 = vsel %vm1949_vm6, %v2441_v20, %v4285_v11  ;;  %v1510_v9 = vmul.f32 0.0625, %v1240_v28  ;;  %v1799_v59 = vunpack.c.l.b16 %v1595_v22  ;;  %v1800_v51 = vunpack.c.h.b16 %v1595_v22  ;;  %3477 = vmatpush3.bf16.msra.mxu1 %v3594_v31 }
 0x15d   : > { %v4382_v58 = vsel %vm1956_vm7, %v2446_v21, %v2442_v29 }
 0x15e   : > { %v1611_v33 = vpack.c.bf16 %v1511_v30, %v1510_v9  ;;  %v2056_v38 = vrot.slane %v1799_v59, %v4373_v54  ;;  %v2061_v39 = vrot.slane %v1800_v51, %v4376_v62  ;;  %v1339_v11 = vpop.xlane.xlu1 %1338 }
 0x15f   : > { %v1336_v7 = vpop.xlane.xlu0 %1335  ;;  %v1543_v61 = vmul.f32 0.0625, %v1339_v11 }
 0x160   : > { %v1831_v40 = vunpack.c.l.b16 %v1611_v33  ;;  %v1832_v41 = vunpack.c.h.b16 %v1611_v33  ;;  %v1542_v43 = vmul.f32 0.0625, %v1336_v7  ;;  %v2057_v13 = vsel %vm1963_vm8, %v2056_v38, %v4296_v32 }
 0x161   : > { %v4390_v44 = vsel %vm1970_vm9, %v2061_v39, %v2057_v13  ;;  %v1972_v13 = vadd.s32 4294967216, %v4018_v23 }
 0x162   : > { %v2214_v18 = vrot.slane %v1831_v40, %v4373_v54  ;;  %v2219_v35 = vrot.slane %v1832_v41, %v4376_v62  ;;  %v1627_v45 = vpack.c.bf16 %v1543_v61, %v1542_v43  ;;  %v1435_v48 = vpop.xlane.xlu1 %1434 }
 0x163   : > { %v1432_v52 = vpop.xlane.xlu0 %1431  ;;  %v1575_v56 = vmul.f32 0.0625, %v1435_v48 }
 0x164   : > { %v2215_v53 = vsel %vm1963_vm8, %v2214_v18, %v4309_v63  ;;  %v1863_v49 = vunpack.c.l.b16 %v1627_v45  ;;  %v1864_v55 = vunpack.c.h.b16 %v1627_v45  ;;  %v1574_v32 = vmul.f32 0.0625, %v1432_v52 }
 0x165   : > { %v4397_v60 = vsel %vm1970_vm9, %v2219_v35, %v2215_v53  ;;  %v1979_v52 = vadd.s32 4294967208, %v4018_v23 }
 0x166   : > { %v2372_v27 = vrot.slane %v1863_v49, %v4373_v54  ;;  %v2377_v10 = vrot.slane %v1864_v55, %v4376_v62  ;;  %v1643_v0 = vpack.c.bf16 %v1575_v56, %v1574_v32  ;;  %v1099_v2 = vpop.xlane.xlu1 %1098 }
 0x167   : > { %v1096_v3 = vpop.xlane.xlu0 %1095  ;;  %v1463_v15 = vmul.f32 0.0625, %v1099_v2 }
 0x168   : > { %v2373_v4 = vsel %vm1963_vm8, %v2372_v27, %v4322_v16  ;;  %v1462_v47 = vmul.f32 0.0625, %v1096_v3  ;;  %v1895_v37 = vunpack.c.l.b16 %v1643_v0  ;;  %v1896_v24 = vunpack.c.h.b16 %v1643_v0 }
 0x169   : > { %v4404_v63 = vsel %vm1970_vm9, %v2377_v10, %v2373_v4  ;;  %v4437_v10 = vsub.s32 %v1972_v13, %v4025_v34  ;;  %v4442_v3 = vsub.s32 %v1979_v52, %v4025_v34 }
 0x16a   : > { %v1587_v12 = vpack.c.bf16 %v1463_v15, %v1462_v47  ;;  %v2530_v5 = vrot.slane %v1895_v37, %v4373_v54  ;;  %v2535_v14 = vrot.slane %v1896_v24, %v4376_v62  ;;  %v1195_v36 = vpop.xlane.xlu1 %1194 }
 0x16b   : > { %v1192_v17 = vpop.xlane.xlu0 %1191  ;;  %v1495_v42 = vmul.f32 0.0625, %v1195_v36 }
 0x16c   : > { %v1783_v46 = vunpack.c.l.b16 %v1587_v12  ;;  %v1784_v6 = vunpack.c.h.b16 %v1587_v12  ;;  %v1494_v19 = vmul.f32 0.0625, %v1192_v17  ;;  %v2531_v16 = vsel %vm1963_vm8, %v2530_v5, %v4331_v25 }
 0x16d   : > { %v4411_v20 = vsel %vm1970_vm9, %v2535_v14, %v2531_v16 }
 0x16e   : > { %v1962_v21 = vrot.slane %v1783_v46, %v4373_v54  ;;  %v1969_v22 = vrot.slane %v1784_v6, %v4376_v62  ;;  %v1603_v26 = vpack.c.bf16 %v1495_v42, %v1494_v19  ;;  %v1291_v28 = vpop.xlane.xlu1 %1290 }
 0x16f   : > { %v1527_v57 = vmul.f32 0.0625, %v1291_v28  ;;  %v1288_v59 = vpop.xlane.xlu0 %1287 }
 0x170   : > { %v1964_v29 = vsel %vm1963_vm8, %v1962_v21, %v4342_v8  ;;  %v1815_v30 = vunpack.c.l.b16 %v1603_v26  ;;  %v1816_v9 = vunpack.c.h.b16 %v1603_v26  ;;  %v1526_v25 = vmul.f32 0.0625, %v1288_v59 }
 0x171   : > { %v4418_v51 = vsel %vm1970_vm9, %v1969_v22, %v1964_v29 }
 0x172   : > { %v2135_v31 = vrot.slane %v1815_v30, %v4373_v54  ;;  %v2140_v33 = vrot.slane %v1816_v9, %v4376_v62  ;;  %v1619_v38 = vpack.c.bf16 %v1527_v57, %v1526_v25  ;;  %v1387_v39 = vpop.xlane.xlu1 %1386 }
 0x173   : > { %v1559_v7 = vmul.f32 0.0625, %v1387_v39  ;;  %v1384_v40 = vpop.xlane.xlu0 %1383 }
 0x174   : > { %v2136_v11 = vsel %vm1963_vm8, %v2135_v31, %v4355_v1  ;;  %v1847_v41 = vunpack.c.l.b16 %v1619_v38  ;;  %v1848_v61 = vunpack.c.h.b16 %v1619_v38  ;;  %v1558_v43 = vmul.f32 0.0625, %v1384_v40 }
 0x175   : > { %v4425_v8 = vsel %vm1970_vm9, %v2140_v33, %v2136_v11 }
 0x176   : > { %v2293_v18 = vrot.slane %v1847_v41, %v4373_v54  ;;  %v2298_v35 = vrot.slane %v1848_v61, %v4376_v62  ;;  %v1635_v45 = vpack.c.bf16 %v1559_v7, %v1558_v43  ;;  %v1153_v48 = vpop.xlane.xlu1 %1152 }
 0x177   : > { %v1481_v53 = vmul.f32 0.0625, %v1153_v48  ;;  %v1150_v1 = vpop.xlane.xlu0 %1149 }
 0x178   : > { %v2294_v49 = vsel %vm1963_vm8, %v2293_v18, %v4366_v50  ;;  %v1879_v55 = vunpack.c.l.b16 %v1635_v45  ;;  %v1880_v56 = vunpack.c.h.b16 %v1635_v45  ;;  %v1480_v32 = vmul.f32 0.0625, %v1150_v1 }
 0x179   : > { %v4434_v27 = vsel %vm1970_vm9, %v2298_v35, %v2294_v49 }
 0x17a   : > { %v2451_v0 = vrot.slane %v1879_v55, %v4373_v54  ;;  %v2456_v2 = vrot.slane %v1880_v56, %v4376_v62  ;;  %v1596_v4 = vpack.c.bf16 %v1481_v53, %v1480_v32  ;;  %v1249_v15 = vpop.xlane.xlu1 %1248 }
 0x17b   : > { %v1513_v47 = vmul.f32 0.0625, %v1249_v15  ;;  %v1246_v50 = vpop.xlane.xlu0 %1245 }
 0x17c   : > { %v2452_v37 = vsel %vm1963_vm8, %v2451_v0, %v4382_v58  ;;  %v1801_v24 = vunpack.c.l.b16 %v1596_v4  ;;  %v1802_v12 = vunpack.c.h.b16 %v1596_v4  ;;  %v1512_v5 = vmul.f32 0.0625, %v1246_v50 }
 0x17d   : > { %v4447_v14 = vsel %vm1970_vm9, %v2456_v2, %v2452_v37 }
 0x17e   : > { %v2066_v54 = vrot.slane %v1801_v24, %v4437_v10  ;;  %v2071_v62 = vrot.slane %v1802_v12, %v4442_v3  ;;  %v1612_v36 = vpack.c.bf16 %v1513_v47, %v1512_v5  ;;  %v1345_v17 = vpop.xlane.xlu1 %1344 }
 0x17f   : > { %v1342_v46 = vpop.xlane.xlu0 %1341  ;;  %v1545_v47 = vmul.f32 0.0625, %v1345_v17  ;;  %v1993_v17 = vadd.s32 4294967192, %v4018_v23 }
 0x180   : > { %v2067_v6 = vsel %vm1977_vm10, %v2066_v54, %v4390_v44  ;;  %v1833_v42 = vunpack.c.l.b16 %v1612_v36  ;;  %v1834_v58 = vunpack.c.h.b16 %v1612_v36  ;;  %v1544_v50 = vmul.f32 0.0625, %v1342_v46 }
 0x181   : > { %v4454_v19 = vsel %vm1984_vm11, %v2071_v62, %v2067_v6  ;;  %v1986_v6 = vadd.s32 4294967200, %v4018_v23 }
 0x182   : > { %v2224_v16 = vrot.slane %v1833_v42, %v4437_v10  ;;  %v2229_v21 = vrot.slane %v1834_v58, %v4442_v3  ;;  %v1441_v22 = vpop.xlane.xlu1 %1440  ;;  %v1628_v54 = vpack.c.bf16 %v1545_v47, %v1544_v50 }
 0x183   : > { %v1438_v26 = vpop.xlane.xlu0 %1437  ;;  %v1577_v37 = vmul.f32 0.0625, %v1441_v22 }
 0x184   : > { %v2225_v28 = vsel %vm1977_vm10, %v2224_v16, %v4397_v60  ;;  %v1576_v24 = vmul.f32 0.0625, %v1438_v26  ;;  %v1865_v16 = vunpack.c.l.b16 %v1628_v54 }
 0x185   : > { %v4461_v29 = vsel %vm1984_vm11, %v2229_v21, %v2225_v28 }
 0x186   : > { %v1105_v30 = vpop.xlane.xlu1 %1104  ;;  %v1644_v62 = vpack.c.bf16 %v1577_v37, %v1576_v24 }
 0x187   : > { %v1465_v9 = vmul.f32 0.0625, %v1105_v30  ;;  %v1102_v44 = vpop.xlane.xlu0 %1101 }
 0x188   : > { %v1464_v57 = vmul.f32 0.0625, %v1102_v44 }
 0x18a   : > { %v1588_v59 = vpack.c.bf16 %v1465_v9, %v1464_v57  ;;  %v1201_v25 = vpop.xlane.xlu1 %1200  ;;  %v1897_v9 = vunpack.c.l.b16 %v1644_v62  ;;  %v4486_v57 = vsub.s32 %v1986_v6, %v4025_v34 }
 0x18b   : > { %v1497_v31 = vmul.f32 0.0625, %v1201_v25  ;;  %v1198_v33 = vpop.xlane.xlu0 %1197 }
 0x18c   : > { %v1785_v38 = vunpack.c.l.b16 %v1588_v59  ;;  %v1786_v39 = vunpack.c.h.b16 %v1588_v59  ;;  %v1496_v11 = vmul.f32 0.0625, %v1198_v33  ;;  %v4491_v33 = vsub.s32 %v1993_v17, %v4025_v34 }
 0x18e   : > { %v1976_v7 = vrot.slane %v1785_v38, %v4437_v10  ;;  %v1983_v40 = vrot.slane %v1786_v39, %v4442_v3  ;;  %v1604_v41 = vpack.c.bf16 %v1497_v31, %v1496_v11  ;;  %v1297_v60 = vpop.xlane.xlu1 %1296  ;;  %v1866_v31 = vunpack.c.h.b16 %v1628_v54 }
 0x18f   : > { %v1294_v61 = vpop.xlane.xlu0 %1293  ;;  %v1529_v21 = vmul.f32 0.0625, %v1297_v60  ;;  %v2000_v38 = vadd.s32 4294967184, %v4018_v23  ;;  %v2007_v39 = vadd.s32 4294967176, %v4018_v23  ;;  %v2382_v11 = vrot.slane %v1865_v16, %v4437_v10 }
 0x190   : > { %v1978_v43 = vsel %vm1977_vm10, %v1976_v7, %v4418_v51  ;;  %v1817_v13 = vunpack.c.l.b16 %v1604_v41  ;;  %v1818_v18 = vunpack.c.h.b16 %v1604_v41  ;;  %v1528_v28 = vmul.f32 0.0625, %v1294_v61 }
 0x191   : > { %v4468_v35 = vsel %vm1984_vm11, %v1983_v40, %v1978_v43  ;;  %v1898_v60 = vunpack.c.h.b16 %v1644_v62  ;;  %v2540_v61 = vrot.slane %v1897_v9, %v4437_v10  ;;  %v2387_v23 = vrot.slane %v1866_v31, %v4442_v3 }
 0x192   : > { %v2145_v45 = vrot.slane %v1817_v13, %v4437_v10  ;;  %v2150_v48 = vrot.slane %v1818_v18, %v4442_v3  ;;  %v1393_v52 = vpop.xlane.xlu1 %1392  ;;  %v1620_v7 = vpack.c.bf16 %v1529_v21, %v1528_v28 }
 0x193   : > { %v1390_v53 = vpop.xlane.xlu0 %1389  ;;  %v1561_v43 = vmul.f32 0.0625, %v1393_v52  ;;  %v2383_v52 = vsel %vm1977_vm10, %v2382_v11, %v4404_v63 }
 0x194   : > { %v2146_v1 = vsel %vm1977_vm10, %v2145_v45, %v4425_v8  ;;  %v1560_v13 = vmul.f32 0.0625, %v1390_v53  ;;  %v1849_v53 = vunpack.c.l.b16 %v1620_v7  ;;  %v1850_v16 = vunpack.c.h.b16 %v1620_v7 }
 0x195   : > { %v4475_v49 = vsel %vm1984_vm11, %v2150_v48, %v2146_v1  ;;  %v2388_v17 = vsel %vm1984_vm11, %v2387_v23, %v2383_v52 }
 0x196   : > { %v1159_v55 = vpop.xlane.xlu1 %1158  ;;  %v2303_v21 = vrot.slane %v1849_v53, %v4437_v10 }
 0x197   : > { %v1156_v56 = vpop.xlane.xlu0 %1155  ;;  %v1483_v36 = vmul.f32 0.0625, %v1159_v55 }
 0x198   : > { %v1482_v42 = vmul.f32 0.0625, %v1156_v56  ;;  %v4503_v56 = vsub.s32 %v2000_v38, %v4025_v34 }
 0x19a   : > { %v1255_v51 = vpop.xlane.xlu1 %1254  ;;  %v1597_v59 = vpack.c.bf16 %v1483_v36, %v1482_v42 }
 0x19b   : > { %v1252_v32 = vpop.xlane.xlu0 %1251  ;;  %v1515_v46 = vmul.f32 0.0625, %v1255_v51  ;;  %v4506_v51 = vsub.s32 %v2007_v39, %v4025_v34 }
 0x19c   : > { %v1514_v22 = vmul.f32 0.0625, %v1252_v32  ;;  %v1803_v45 = vunpack.c.l.b16 %v1597_v59  ;;  %v1804_v47 = vunpack.c.h.b16 %v1597_v59 }
 0x19e   : > { %v1351_v0 = vpop.xlane.xlu1 %1350  ;;  %v1613_v40 = vpack.c.bf16 %v1515_v46, %v1514_v22  ;;  %v2076_v37 = vrot.slane %v1803_v45, %v4486_v57  ;;  %v2081_v9 = vrot.slane %v1804_v47, %v4491_v33 }
 0x19f   : > { %v1348_v2 = vpop.xlane.xlu0 %1347  ;;  %v1547_v26 = vmul.f32 0.0625, %v1351_v0 }
 0x1a0   : > { %v1546_v30 = vmul.f32 0.0625, %v1348_v2  ;;  %v1835_v32 = vunpack.c.l.b16 %v1613_v40  ;;  %v2541_v2 = vsel %vm1977_vm10, %v2540_v61, %v4411_v20  ;;  %v1836_v34 = vunpack.c.h.b16 %v1613_v40 }
 0x1a1   : > { %v2077_v31 = vsel %vm1991_vm12, %v2076_v37, %v4454_v19  ;;  %v4531_v40 = vsel %vm1977_vm10, %v2303_v21, %v4434_v27 }
 0x1a2   : > { %v1447_v4 = vpop.xlane.xlu1 %1446  ;;  %v1629_v41 = vpack.c.bf16 %v1547_v26, %v1546_v30  ;;  %v2234_v20 = vrot.slane %v1835_v32, %v4486_v57  ;;  %v2239_v38 = vrot.slane %v1836_v34, %v4491_v33  ;;  %v2082_v53 = vsel %vm1998_vm13, %v2081_v9, %v2077_v31 }
 0x1a3   : > { %v1444_v15 = vpop.xlane.xlu0 %1443  ;;  %v1579_v48 = vmul.f32 0.0625, %v1447_v4  ;;  %v2545_v4 = vrot.slane %v1898_v60, %v4442_v3 }
 0x1a4   : > { %v1578_v1 = vmul.f32 0.0625, %v1444_v15  ;;  %v1867_v0 = vunpack.c.l.b16 %v1629_v41  ;;  %v4513_v15 = vpack.c.bf16 %v1561_v43, %v1560_v13  ;;  %v1868_v36 = vunpack.c.h.b16 %v1629_v41 }
 0x1a5   : > { %v2546_v46 = vsel %vm1984_vm11, %v2545_v4, %v2541_v2  ;;  %v4534_v41 = vrot.slane %v1850_v16, %v4442_v3  ;;  %v2235_v61 = vsel %vm1991_vm12, %v2234_v20, %v4461_v29 }
 0x1a6   : > { %v1111_v12 = vpop.xlane.xlu1 %1110  ;;  %v1645_v24 = vpack.c.bf16 %v1579_v48, %v1578_v1  ;;  %v2392_v28 = vrot.slane %v1867_v0, %v4486_v57  ;;  %v1881_v22 = vunpack.c.l.b16 %v4513_v15  ;;  %v2397_v39 = vrot.slane %v1868_v36, %v4491_v33 }
 0x1a7   : > { %v1108_v5 = vpop.xlane.xlu0 %1107  ;;  %v1467_v63 = vmul.f32 0.0625, %v1111_v12  ;;  %v1882_v19 = vunpack.c.h.b16 %v4513_v15  ;;  %v2240_v2 = vsel %vm1998_vm13, %v2239_v38, %v2235_v61 }
 0x1a8   : > { %v1466_v6 = vmul.f32 0.0625, %v1108_v5  ;;  %v1899_v12 = vunpack.c.l.b16 %v1645_v24  ;;  %v2393_v60 = vsel %vm1991_vm12, %v2392_v28, %v2388_v17  ;;  %v1900_v43 = vunpack.c.h.b16 %v1645_v24 }
 0x1a9   : > { %v4541_v1 = vrot.slane %v1881_v22, %v4437_v10  ;;  %v2398_v0 = vsel %vm1998_vm13, %v2397_v39, %v2393_v60 }
 0x1aa   : > { %v4477_v8 = vpop.xlane.xlu1 %1206  ;;  %v4527_v11 = vpack.c.bf16 %v1467_v63, %v1466_v6  ;;  %v2550_v27 = vrot.slane %v1899_v12, %v4486_v57  ;;  %v2555_v37 = vrot.slane %v1900_v43, %v4491_v33 }
 0x1ab   : > { %v4480_v58 = vpop.xlane.xlu0 %1203  ;;  %v1499_v4 = vmul.f32 0.0625, %v4477_v8 }
 0x1ac   : > { %v1787_v32 = vunpack.c.l.b16 %v4527_v11  ;;  %v1498_v47 = vmul.f32 0.0625, %v4480_v58  ;;  %v1788_v34 = vunpack.c.h.b16 %v4527_v11  ;;  %v2551_v8 = vsel %vm1991_vm12, %v2550_v27, %v2546_v46 }
 0x1ae   : > { %v4483_v44 = vpop.xlane.xlu1 %1302  ;;  %v1990_v58 = vrot.slane %v1787_v32, %v4486_v57  ;;  %v1605_v28 = vpack.c.bf16 %v1499_v4, %v1498_v47  ;;  %v1997_v4 = vrot.slane %v1788_v34, %v4491_v33 }
 0x1af   : > { %v4488_v25 = vpop.xlane.xlu0 %1299  ;;  %v1531_v36 = vmul.f32 0.0625, %v4483_v44 }
 0x1b0   : > { %v1530_v63 = vmul.f32 0.0625, %v4488_v25 }
 0x1b2   : > { %v4497_v18 = vpop.xlane.xlu1 %1398  ;;  %v1621_v46 = vpack.c.bf16 %v1531_v36, %v1530_v63  ;;  %v1992_v36 = vsel %vm1991_vm12, %v1990_v58, %v4468_v35  ;;  %v1820_v63 = vunpack.c.h.b16 %v1605_v28 }
 0x1b3   : > { %v4499_v55 = vpop.xlane.xlu0 %1395  ;;  %v1999_v15 = vsel %vm1998_vm13, %v1997_v4, %v1992_v36 }
 0x1b4   : > { %v1852_v34 = vunpack.c.h.b16 %v1621_v46 }
 0x1b6   : > { %v1165_v50 = vpop.xlane.xlu1 %1164 }
 0x1b7   : > { %v1485_v54 = vmul.f32 0.0625, %v1165_v50  ;;  %v1162_v62 = vpop.xlane.xlu0 %1161 }
 0x1b8   : > { %v1484_v42 = vmul.f32 0.0625, %v1162_v62 }
 0x1ba   : > { %v1598_v26 = vpack.c.bf16 %v1485_v54, %v1484_v42  ;;  %v1261_v30 = vpop.xlane.xlu1 %1260 }
 0x1bb   : > { %v1517_v5 = vmul.f32 0.0625, %v1261_v30  ;;  %v1258_v59 = vpop.xlane.xlu0 %1257 }
 0x1bc   : > { %v1516_v7 = vmul.f32 0.0625, %v1258_v59  ;;  %v1805_v13 = vunpack.c.l.b16 %v1598_v26  ;;  %v1806_v10 = vunpack.c.h.b16 %v1598_v26  ;;  %v1562_v59 = vmul.f32 0.0625, %v4499_v55 }
 0x1be   : > { %v1614_v45 = vpack.c.bf16 %v1517_v5, %v1516_v7  ;;  %v1357_v48 = vpop.xlane.xlu1 %1356  ;;  %v2086_v24 = vrot.slane %v1805_v13, %v4503_v56  ;;  %v2091_v17 = vrot.slane %v1806_v10, %v4506_v51  ;;  %v1563_v5 = vmul.f32 0.0625, %v4497_v18 }
 0x1bf   : > { %v1549_v23 = vmul.f32 0.0625, %v1357_v48  ;;  %v1354_v52 = vpop.xlane.xlu0 %1353 }
 0x1c0   : > { %v1548_v29 = vmul.f32 0.0625, %v1354_v52  ;;  %v1837_v50 = vunpack.c.l.b16 %v1614_v45  ;;  %v1838_v22 = vunpack.c.h.b16 %v1614_v45  ;;  %v2087_v12 = vsel %vm2005_vm14, %v2086_v24, %v2082_v53 }
 0x1c1   : > { %v2092_v43 = vsel %vm2012_vm15, %v2091_v17, %v2087_v12  ;;  %v1851_v52 = vunpack.c.l.b16 %v1621_v46  ;;  %v1637_v47 = vpack.c.bf16 %v1563_v5, %v1562_v59  ;;  %v2309_v17 = vsel %vm1984_vm11, %v4534_v41, %v4531_v40 }
 0x1c2   : > { %v1630_v54 = vpack.c.bf16 %v1549_v23, %v1548_v29  ;;  %v1453_v62 = vpop.xlane.xlu1 %1452  ;;  %v2244_v26 = vrot.slane %v1837_v50, %v4503_v56  ;;  %v2249_v61 = vrot.slane %v1838_v22, %v4506_v51  ;;  %v1819_v50 = vunpack.c.l.b16 %v1605_v28 }
 0x1c3   : > { %v1581_v6 = vmul.f32 0.0625, %v1453_v62  ;;  %v1450_v42 = vpop.xlane.xlu0 %1449  ;;  %v2466_v22 = vrot.slane %v1882_v19, %v4442_v3  ;;  %v1883_v35 = vunpack.c.l.b16 %v1637_v47  ;;  %v2462_v28 = vsel %vm1977_vm10, %v4541_v1, %v4447_v14 }
 0x1c4   : > { %v1869_v16 = vunpack.c.l.b16 %v1630_v54  ;;  %v1870_v21 = vunpack.c.h.b16 %v1630_v54  ;;  %v1580_v20 = vmul.f32 0.0625, %v1450_v42  ;;  %v2245_v45 = vsel %vm2005_vm14, %v2244_v26, %v2240_v2 }
 0x1c5   : > { %v2250_v54 = vsel %vm2012_vm15, %v2249_v61, %v2245_v45  ;;  %v2155_v26 = vrot.slane %v1819_v50, %v4486_v57  ;;  %v2318_v19 = vrot.slane %v1852_v34, %v4491_v33  ;;  %v1884_v12 = vunpack.c.h.b16 %v1637_v47 }
 0x1c6   : > { %v2402_v30 = vrot.slane %v1869_v16, %v4503_v56  ;;  %v2407_v44 = vrot.slane %v1870_v21, %v4506_v51  ;;  %v1646_v25 = vpack.c.bf16 %v1581_v6, %v1580_v20  ;;  %v1117_v9 = vpop.xlane.xlu1 %1116  ;;  %v2471_v1 = vrot.slane %v1883_v35, %v4486_v57 }
 0x1c7   : > { %v1469_v31 = vmul.f32 0.0625, %v1117_v9  ;;  %v1114_v38 = vpop.xlane.xlu0 %1113  ;;  %v2476_v45 = vrot.slane %v1884_v12, %v4491_v33  ;;  %v3674_v35 = vmov (!%p3105_p11), 0.0   ;;  %v3107_v12 = vld [vmem:[%s4700_s4] ss:$0 sm:$0xff] (!%p3105_p11) }
 0x1c8   : > { %v1901_v39 = vunpack.c.l.b16 %v1646_v25  ;;  %v1902_v11 = vunpack.c.h.b16 %v1646_v25  ;;  %v1468_v7 = vmul.f32 0.0625, %v1114_v38  ;;  %v2403_v60 = vsel %vm2005_vm14, %v2402_v30, %v2398_v0  ;;  %3493 = vmatprep.subr.bf16.mxu0 (!%p3105_p11), %v3674_v35 }
 0x1c9   : > { %v2408_v13 = vsel %vm2012_vm15, %v2407_v44, %v2403_v60  ;;  %v2556_v0 = vsel %vm1998_vm13, %v2555_v37, %v2551_v8  ;;  %v2313_v8 = vrot.slane %v1851_v52, %v4486_v57  ;;  %v2160_v25 = vrot.slane %v1820_v63, %v4491_v33 }
 0x1ca   : > { %v2560_v48 = vrot.slane %v1901_v39, %v4503_v56  ;;  %v2565_v18 = vrot.slane %v1902_v11, %v4506_v51  ;;  %v1590_v55 = vpack.c.bf16 %v1469_v31, %v1468_v7  ;;  %v1213_v27 = vpop.xlane.xlu1 %1212  ;;  %v2569_v23 = vsel %vm2567_vm0, %v2408_v13, %v2092_v43 }
 0x1cb   : > { %v1501_v53 = vmul.f32 0.0625, %v1213_v27  ;;  %v1210_v32 = vpop.xlane.xlu0 %1209  ;;  %v2573_v29 = vpack.c.b16 %v2569_v23, %v2569_v23  ;;  %v2314_v3 = vsel %vm1991_vm12, %v2313_v8, %v2309_v17  ;;  %v2156_v38 = vsel %vm1991_vm12, %v2155_v26, %v4475_v49  ;;  %v3598_v26 = vld [vmem:[%s4699_s3 + $0x18] sm:$0xff] (!%p3105_p11)  }
 0x1cc   : > { %v1500_v10 = vmul.f32 0.0625, %v1210_v32  ;;  %v2561_v2 = vsel %vm2005_vm14, %v2560_v48, %v2556_v0  ;;  %v1789_v24 = vunpack.c.l.b16 %v1590_v55  ;;  %v1790_v30 = vunpack.c.h.b16 %v1590_v55 }
 0x1cd   : > { %2804 = vmatprep.mubr.bf16.mxu0 %v2573_v29  ;;  %v2566_v62 = vsel %vm2012_vm15, %v2565_v18, %v2561_v2  ;;  %v2467_v57 = vsel %vm1984_vm11, %v2466_v22, %v2462_v28  ;;  %v2319_v48 = vsel %vm1998_vm13, %v2318_v19, %v2314_v3  ;;  %v2161_v32 = vsel %vm1998_vm13, %v2160_v25, %v2156_v38  ;;  %v3595_v22 = vld [vmem:[%s4699_s3] sm:$0xff] (!%p3105_p11)   ;;  %v3597_v28 = vld [vmem:[%s4699_s3 + $0x10] sm:$0xff] (!%p3105_p11)   ;;  %v3602_v3 = vld [vmem:[%s4699_s3 + $0x38] sm:$0xff] (!%p3105_p11)  }
 0x1ce   : > { %v1606_v6 = vpack.c.bf16 %v1501_v53, %v1500_v10  ;;  %v1309_v42 = vpop.xlane.xlu1 %1308  ;;  %v2571_v37 = vsel %vm2567_vm0, %v2566_v62, %v2250_v54  ;;  %v2004_v44 = vrot.slane %v1789_v24, %v4503_v56  ;;  %v2011_v39 = vrot.slane %v1790_v30, %v4506_v51  ;;  %v3599_v30 = vld [vmem:[%s4699_s3 + $0x20] sm:$0xff] (!%p3105_p11)  }
 0x1cf   : > { %v1533_v16 = vmul.f32 0.0625, %v1309_v42  ;;  %v1306_v21 = vpop.xlane.xlu0 %1305  ;;  %v2575_v20 = vpack.c.b16 %v2571_v37, %v2571_v37  ;;  %v2472_v49 = vsel %vm1991_vm12, %v2471_v1, %v2467_v57 }
 0x1d0   : > { %v1532_v58 = vmul.f32 0.0625, %v1306_v21  ;;  %v1821_v9 = vunpack.c.l.b16 %v1606_v6  ;;  %v1822_v11 = vunpack.c.h.b16 %v1606_v6  ;;  %v2006_v7 = vsel %vm2005_vm14, %v2004_v44, %v1999_v15  ;;  %v3600_v44 = vld [vmem:[%s4699_s3 + $0x28] sm:$0xff] (!%p3105_p11)  }
 0x1d1   : > { %2844 = vmatprep.mubr.bf16.mxu1 %v2575_v20  ;;  %v2013_v52 = vsel %vm2012_vm15, %v2011_v39, %v2006_v7  ;;  %v2477_v10 = vsel %vm1998_vm13, %v2476_v45, %v2472_v49 }
 0x1d2   : > { %v1622_v40 = vpack.c.bf16 %v1533_v16, %v1532_v58  ;;  %v1405_v41 = vpop.xlane.xlu1 %1404  ;;  %v2165_v60 = vrot.slane %v1821_v9, %v4503_v56  ;;  %v2170_v23 = vrot.slane %v1822_v11, %v4506_v51  ;;  %v1582_v16 = vld [vmem:[#allocation2] sm:$0x3]  ;;  %v3596_v58 = vld [vmem:[%s4699_s3 + $0x8] sm:$0xff] (!%p3105_p11)  }
 0x1d3   : > { %v1565_v46 = vmul.f32 0.0625, %v1405_v41  ;;  %v1402_v14 = vpop.xlane.xlu0 %1401  ;;  %v3106_v9 = vld [vmem:[%s4698_s2] ss:$0 sm:$0xff] (!%p3105_p11)  ;;  %v3601_v41 = vld [vmem:[%s4699_s3 + $0x30] sm:$0xff] (!%p3105_p11)  }
 0x1d4   : > { %v1853_v5 = vunpack.c.l.b16 %v1622_v40  ;;  %v1854_v59 = vunpack.c.h.b16 %v1622_v40  ;;  %v1564_v31 = vmul.f32 0.0625, %v1402_v14  ;;  %v2166_v4 = vsel %vm2005_vm14, %v2165_v60, %v2161_v32 }
 0x1d5   : > { %v2171_v50 = vsel %vm2012_vm15, %v2170_v23, %v2166_v4 }
 0x1d6   : > { %v2323_v61 = vrot.slane %v1853_v5, %v4503_v56  ;;  %v2328_v43 = vrot.slane %v1854_v59, %v4506_v51  ;;  %v1638_v13 = vpack.c.bf16 %v1565_v46, %v1564_v31 }
 0x1d8   : > { %v1885_v18 = vunpack.c.l.b16 %v1638_v13  ;;  %v1886_v55 = vunpack.c.h.b16 %v1638_v13  ;;  %v2324_v27 = vsel %vm2005_vm14, %v2323_v61, %v2319_v48 }
 0x1d9   : > { %v2329_v53 = vsel %vm2012_vm15, %v2328_v43, %v2324_v27 }
 0x1da   : > { %v2481_v29 = vrot.slane %v1885_v18, %v4503_v56  ;;  %v2486_v33 = vrot.slane %v1886_v55, %v4506_v51  ;;  %v2568_v0 = vsel %vm2567_vm0, %v2329_v53, %v2013_v52 }
 0x1db   : > { %v2572_v47 = vpack.c.b16 %v2568_v0, %v2568_v0 }
 0x1dc   : > { %v2482_v2 = vsel %vm2005_vm14, %v2481_v29, %v2477_v10 }
 0x1dd   : > { %2805 = vmatmul.mubr.bf16.vlgmr.msra.gmra.mrb[0].mxu0 %v2572_v47  ;;  %v2487_v24 = vsel %vm2012_vm15, %v2486_v33, %v2482_v2 }
 0x1de   : > { %v2570_v54 = vsel %vm2567_vm0, %v2487_v24, %v2171_v50  ;;  %3494 = vmatpush3.bf16.msra.mxu0 (!%p3105_p11), %v3595_v22  ;;  %3509 = vmatprep.mubr.msk.bf16.mxu0 (!%p3105_p11), %vm3675_vm1, %v3674_v35 }
 0x1df   : > { %v2574_v62 = vpack.c.b16 %v2570_v54, %v2570_v54  ;;  %3495 = vmatprep.subr.bf16.mxu0 (!%p3105_p11), %v3674_v35 }
 0x1e1   : > { %2845 = vmatmul.mubr.bf16.vlgmr.msra.gmra.mrb[0].mxu1 %v2574_v62 }
 0x1e2   : > { %3496 = vmatpush3.bf16.msra.mxu0 (!%p3105_p11), %v3596_v58 }
 0x1e3   : > { %3497 = vmatprep.subr.bf16.mxu0 (!%p3105_p11), %v3674_v35 }
 0x1e6   : > { %3498 = vmatpush3.bf16.msra.mxu0 (!%p3105_p11), %v3597_v28 }
 0x1e7   : > { %3499 = vmatprep.subr.bf16.mxu0 (!%p3105_p11), %v3674_v35 }
 0x1ea   : > { %3500 = vmatpush3.bf16.msra.mxu0 (!%p3105_p11), %v3598_v26 }
 0x1eb   : > { %3501 = vmatprep.subr.bf16.mxu0 (!%p3105_p11), %v3674_v35 }
 0x1ee   : > { %3502 = vmatpush3.bf16.msra.mxu0 (!%p3105_p11), %v3599_v30 }
 0x1ef   : > { %3503 = vmatprep.subr.bf16.mxu0 (!%p3105_p11), %v3674_v35 }
 0x1f2   : > { %3504 = vmatpush3.bf16.msra.mxu0 (!%p3105_p11), %v3600_v44 }
 0x1f3   : > { %3505 = vmatprep.subr.bf16.mxu0 (!%p3105_p11), %v3674_v35 }
 0x1f6   : > { %3506 = vmatpush3.bf16.msra.mxu0 (!%p3105_p11), %v3601_v41 }
 0x1f7   : > { %3507 = vmatprep.subr.bf16.mxu0 (!%p3105_p11), %v3674_v35 }
 0x1fa   : > { %3508 = vmatpush3.bf16.msra.mxu0 (!%p3105_p11), %v3602_v3 }
 0x2b0   : > { %v3456_v56 = vpop.f32.mrb[0].mxu0 }
 0x2b1   : > { %v3457_v51 = vpop.f32.mrb[1].mxu0 }
 0x2b2   : > { %v3458_v36 = vadd.f32 %v3457_v51, %v3456_v56  ;;  %v3459_v63 = vpop.f32.mrb[2].mxu0 }
 0x2b3   : > { %v3460_v6 = vpop.f32.mrb[3].mxu0 }
 0x2b4   : > { %v3478_v42 = vpop.f32.mrb[0].mxu1 }
 0x2b5   : > { %v3479_v37 = vpop.f32.mrb[1].mxu1 }
 0x2b6   : > { %v3480_v34 = vadd.f32 %v3479_v37, %v3478_v42  ;;  %v3481_v8 = vpop.f32.mrb[2].mxu1  ;;  %2857 = sbr.rel (%p3105_p11) target bundleno = 931 (0x3a3), region = 89 }
 0x2b7   : > { %v3482_v21 = vpop.f32.mrb[3].mxu1 }
 0x2b8   : > { %v2847_v20 = vadd.f32 %v3480_v34, %v3458_v36 }
 0x2ba   : > { %v2852_v17 = vadd.f32 %v2847_v20, %v1582_v16 }
 0x2bc   : > { %2853 = vst [vmem:[#allocation2] sm:$0x3] %v2852_v17 }
 0x2c3   : > { %v2858_v25 = vld [vmem:[#allocation2] sm:$0x3] }
 0x2c4   : > { %v2866_v40 = vadd.f32 %v3106_v9, %v2858_v25 }
 0x2c6   : > { %v2867_v15 = vmax.f32 %v2866_v40, 0.0 }
 0x2c8   : > { %v2868_v19 = vpack.c.bf16 %v2867_v15, %v2867_v15 }
 0x2ca   : > { %3510 = vmatmul.mubr.bf16.vlgmr.msra.gmra.mrb[0].mxu0 %v2868_v19 }
 0x39d   : > { %v2974_v46 = vpop.f32.mrb[0].mxu0 }
 0x39e   : > { %v2975_v14 = vadd.f32 %v3107_v12, %v2974_v46  ;;  %v3511_v1 = vpop.f32.mrb[1].mxu0 }
 0x39f   : > { %v2977_v5 = vpop.f32.mrb[2].mxu0 }
 0x3a0   : > { %v2980_v59 = vmax.f32 %v2975_v14, 0.0  ;;  %v3512_v31 = vpop.f32.mrb[3].mxu0 }
 0x3a2   : > { %2981 = vst [vmem:[#allocation4] sm:$0x3] %v2980_v59 }
 0x3a3 PF: > { %p4655_p12 = scmp.eq.s32.totalorder %s3062_s23, 3  ;;  %s3676_s26 = smov [#allocation4]  }
 0x3a4   : > { %s2991_s28 = sshll.u32 %s3676_s26, 4  ;;  %s2992_s28 = int_to_ptr.vmem [resolvable:$true] %s2991_s28 }
 0x3a5   : > { %s3603_s29 = scalar_lea.vmem %s2992_s28, 32  ;;  %p3610_p2 = scmp.lt.s32.totalorder %s2992_s28, %s2992_s28 }
 0x3a6   : > { %p3604_p13 = scmp.ne.s32.totalorder %s2992_s28, %s3603_s29  ;;  %p3611_p3 = scmp.lt.s32.totalorder %s3603_s29, %s3603_s29 }
 0x3a8   : > { %p3605_p0 = pnand %p3604_p13, %p4655_p12  ;;  %p3612_p4 = por %p3611_p3, %p3610_p2 }
 0x3aa   : > { %p3606_p1 = pneg %p3605_p0 }
 0x3ac   : > { %p3613_p5 = pnand %p3612_p4, %p3606_p1 }
 0x3ae   : > { %3616 = shalt.err (!%p3613_p5)
}
 0x3af   : > { %s3617_s23 = scalar_lea.hbm %s4701_s5, 32 }
 0x3b0   : > { %p3618_p6 = scmp.ne.s32.totalorder %s4701_s5, %s3617_s23  ;;  %p3623_p9 = scmp.lt.u32.totalorder %s3617_s23, %s4701_s5 }
 0x3b2   : > { %p3619_p7 = pnand %p3618_p6, %p4655_p12 }
 0x3b4   : > { %p3620_p8 = pneg %p3619_p7 }
 0x3b6   : > { %p3625_p10 = pnand %p3623_p9, %p3620_p8 }
 0x3b8   : > { %3628 = shalt.err (!%p3625_p10)
}
 0x3b9   : > { %3514 = dma.vmem_to_hbm [thread:$0]  (%p4655_p12), %s2992_s28, 32, %s4701_s5, [#allocation5]  }
 0x3ba   : > { %3650 = dma.done.wait (%p4655_p12), [#allocation5], 32  }
 0x3bb   : > { %3652 = vsyncadd (%p4655_p12), [#allocation5], 4294967264 }
 0x3bc PF: > { %s16_s22 = sadd.s32 1, %s3671_s22   ;;  %s4703_s18 = smov %s3659_s19 }
 0x3bd   : > { %p13_p11 = scmp.ge.s32.totalorder %s16_s22, 6   ;;  %s4704_s19 = smov %s3743_s27 }
 0x3be   : > { %s4705_s20 = smov %s3667_s21  ;;  %s4706_s21 = smov %s4708_s24 }
 0x3bf   :  { %15 = sbr.rel (!%p13_p11) target bundleno = 3 (0x3), region = 125 }
 0x3c6   :  { %3004 = vsyncpa [#allocation5], 1 }
 0x3c7   :  { %3006 = vsyncpa [#allocation5 + $0x1], 1 }

</bundles_post_ra>
